<compile_context>
chip_gen: v5e
topology: v5e:2x2
jax: 0.10.0
libtpu: 0.0.40
codegen_flags: <defaults>
</compile_context>

<pallas_src>
import functools

import jax
import jax.numpy as jnp
from jax import lax
from jax.experimental import pallas as pl
from jax.experimental.pallas import tpu as pltpu


# ---------------------------------------------------------------------------
# Fused Up-block kernel: concat + conv1+BN+ReLU + conv2+BN+ReLU (lane-dense).
# ---------------------------------------------------------------------------
def _up_block_kernel(masks_ref, x2_ref, up_ref, w1_ref, s1_ref, b1_ref,
                     w2_ref, s2_ref, b2_ref, o_ref, *, W, use_im2col):
    # masks_ref : (9, 1, HW) f32   0/1 validity mask per 3x3 tap (border zeroing)
    # x2_ref    : (1, C, HW) bf16  skip connection, channel-major, flat spatial
    # up_ref    : (1, C, HW) bf16  upsampled-and-padded x1
    # w1_ref    : (Cout, 18C) bf16 [im2col]  or  (18, Cout, C) bf16 [fallback]
    #             taps ordered [x2 taps 0..8, up taps 0..8], tap-major.
    # w2_ref    : (Cout, 9*Cout) bf16  or  (9, Cout, Cout) bf16
    # s*/b*     : (Cout, 1) f32    folded BatchNorm(eval) scale / bias
    # o_ref     : (1, Cout, HW) f32  flattened-NCHW output block
    HW = o_ref.shape[-1]

    def taps_of(x_f32):
        """9 masked 3x3 taps of a (cin, HW) image as bf16 MXU operands."""
        taps = []
        for dy in range(3):
            for dx in range(3):
                # tap[c, i*W + j] = x[c, i+dy-1, j+dx-1]  (0 outside the image)
                shift = ((1 - dy) * W + (1 - dx)) % HW
                t = x_f32 if shift == 0 else pltpu.roll(x_f32, shift, axis=1)
                t = t * masks_ref[dy * 3 + dx]        # zero border / roll wrap
                taps.append(t.astype(jnp.bfloat16))
        return taps

    def conv(taps, w_ref):
        if use_im2col:              # single K = n_taps*cin MXU contraction
            patches = jnp.concatenate(taps, axis=0)
            return jnp.dot(w_ref[...], patches,
                           preferred_element_type=jnp.float32)
        acc = jnp.dot(w_ref[0], taps[0], preferred_element_type=jnp.float32)
        for t in range(1, len(taps)):
            acc = acc + jnp.dot(w_ref[t], taps[t],
                                preferred_element_type=jnp.float32)
        return acc

    # conv1 over cat([x2, up], channel): taps ordered [x2 taps..., up taps...]
    taps1 = (taps_of(x2_ref[0].astype(jnp.float32)) +
             taps_of(up_ref[0].astype(jnp.float32)))
    y1 = conv(taps1, w1_ref)                              # (Cout, HW) f32
    y1 = jnp.maximum(y1 * s1_ref[...] + b1_ref[...], 0.0)

    y2 = conv(taps_of(y1), w2_ref)                        # (Cout, HW) f32
    y2 = jnp.maximum(y2 * s2_ref[...] + b2_ref[...], 0.0)
    o_ref[0] = y2.astype(o_ref.dtype)


# ---------------------------------------------------------------------------
# Host-side helpers (masks, weight slabs, F.pad semantics).
# ---------------------------------------------------------------------------
def _tap_masks(H, W):
    """(9, 1, H*W) f32 validity masks for the 9 taps of a 3x3 'same' conv."""
    idx = jnp.arange(H * W, dtype=jnp.int32)
    i, j = idx // W, idx % W
    rows = []
    for dy in range(3):
        for dx in range(3):
            ok = ((i + dy - 1 >= 0) & (i + dy - 1 < H) &
                  (j + dx - 1 >= 0) & (j + dx - 1 < W))
            rows.append(ok)
    return jnp.stack(rows).astype(jnp.float32).reshape(9, 1, H * W)


def _w_taps(w_hwio):
    """(3,3,ci,co) -> (9, co, ci): per-tap matmul form."""
    ci, co = w_hwio.shape[2], w_hwio.shape[3]
    return jnp.transpose(w_hwio, (0, 1, 3, 2)).reshape(9, co, ci)


def _w_slab(w_hwio):
    """(3,3,ci,co) -> (co, 9*ci): im2col form, columns tap-major then cin."""
    ci, co = w_hwio.shape[2], w_hwio.shape[3]
    return jnp.transpose(w_hwio, (3, 0, 1, 2)).reshape(co, 9 * ci)


def _pad_or_crop_hw(x, d_h, d_w):
    """PyTorch F.pad(x, (dW//2, dW-dW//2, dH//2, dH-dH//2)) on NCHW, including
    negative-pad (crop) semantics."""
    def one_axis(x, amount, axis):
        lo, hi = amount // 2, amount - amount // 2
        size = x.shape[axis]
        start, stop = max(-lo, 0), size + min(hi, 0)
        if start != 0 or stop != size:
            x = lax.slice_in_dim(x, start, stop, axis=axis)
        lo, hi = max(lo, 0), max(hi, 0)
        if lo or hi:
            pads = [(0, 0)] * x.ndim
            pads[axis] = (lo, hi)
            x = jnp.pad(x, pads)
        return x
    return one_axis(one_axis(x, d_h, 2), d_w, 3)


def _conv_transpose_2x2(x1, wt, bt):
    """ConvTranspose2d(C, C, 2, stride=2) in NCHW; wt is (Cin, 2, 2, Cout)."""
    N, C, H1, W1 = x1.shape
    up = jnp.einsum("ncij,cpqd->ndipjq", x1, wt).reshape(N, wt.shape[-1],
                                                         2 * H1, 2 * W1)
    return up + bt.reshape(1, -1, 1, 1)


def _const_spec(a):
    nd = a.ndim
    return pl.BlockSpec(a.shape, lambda n: (0,) * nd)


# ---------------------------------------------------------------------------
# Up block wrapper (one fused pallas_call, NCHW in / NCHW out).
# ---------------------------------------------------------------------------
def up_block(x1, x2, p):
    """One Up(in_ch, out_ch) block.  Call eagerly: the im2col -> per-tap
    fallback relies on eager dispatch to catch a Mosaic lowering rejection."""
    N, C, H1, W1 = x1.shape
    _, C2, H2, W2 = x2.shape
    assert C2 == C and p["w1"].shape[2] == 2 * C
    Cout = p["w2"].shape[-1]
    HW = H2 * W2

    # ConvTranspose2d + F.pad in XLA (4x fewer pixels than the convs).
    # TODO(synk): fold the upsample interleave into the fused kernel
    # (needs strided sublane/lane stores into VMEM scratch).
    up = _pad_or_crop_hw(_conv_transpose_2x2(x1, p["wt"], p["bt"]),
                         H2 - 2 * H1, W2 - 2 * W1)

    masks = _tap_masks(H2, W2)
    x2_f = x2.reshape(N, C, HW).astype(jnp.bfloat16)      # bf16 MXU operands
    up_f = up.reshape(N, C, HW).astype(jnp.bfloat16)
    w1a, w1b = p["w1"][:, :, :C, :], p["w1"][:, :, C:, :]  # x2- / up-channels

    def run(use_im2col):
        if use_im2col:      # one K = 9*(2C) contraction for conv1
            w1_k = jnp.concatenate([_w_slab(w1a), _w_slab(w1b)], axis=1)
            w2_k = _w_slab(p["w2"])
        else:               # per-tap K = C matmuls
            w1_k = jnp.concatenate([_w_taps(w1a), _w_taps(w1b)], axis=0)
            w2_k = _w_taps(p["w2"])
        w1_k, w2_k = w1_k.astype(jnp.bfloat16), w2_k.astype(jnp.bfloat16)
        kernel = functools.partial(_up_block_kernel, W=W2,
                                   use_im2col=use_im2col)
        out = pl.pallas_call(
            kernel,
            out_shape=jax.ShapeDtypeStruct((N, Cout, HW), jnp.float32),
            grid=(N,),
            in_specs=[
                _const_spec(masks),
                pl.BlockSpec((1, C, HW), lambda n: (n, 0, 0)),
                pl.BlockSpec((1, C, HW), lambda n: (n, 0, 0)),
                _const_spec(w1_k), _const_spec(p["s1"]), _const_spec(p["b1"]),
                _const_spec(w2_k), _const_spec(p["s2"]), _const_spec(p["b2"]),
            ],
            out_specs=pl.BlockSpec((1, Cout, HW), lambda n: (n, 0, 0)),
            # No scratch; blocks are a few hundred KB so the default scoped
            # VMEM limit is ample and double-buffering survives on v5e.
            # TODO(synk): halo'd row-block tiling + second "parallel" axis for
            # production resolutions on v7x (64 MiB VMEM / 2 TensorCores).
            compiler_params=pltpu.CompilerParams(
                dimension_semantics=("parallel",)),
        )(masks, x2_f, up_f, w1_k, p["s1"], p["b1"], w2_k, p["s2"], p["b2"])
        return jax.block_until_ready(out)

    try:
        out = run(use_im2col=True)
    except Exception:       # sublane-axis tap concat not supported -> per-tap
        out = run(use_im2col=False)
    return out.reshape(N, Cout, H2, W2)


# ---------------------------------------------------------------------------
# Parameters (deterministic; BatchNorm eval-mode folded).
# ---------------------------------------------------------------------------
def _fold_bn_eval(conv_bias, gamma=None, beta=None, mean=None, var=None,
                  eps=1e-5):
    """Fold BatchNorm2d(eval) with the conv bias: y = conv_nobias(x)*s + b.
    Defaults mirror fresh PyTorch buffers (mean=0, var=1, gamma=1, beta=0)."""
    cout = conv_bias.shape[0]
    gamma = jnp.ones((cout,), jnp.float32) if gamma is None else gamma
    beta = jnp.zeros((cout,), jnp.float32) if beta is None else beta
    mean = jnp.zeros((cout,), jnp.float32) if mean is None else mean
    var = jnp.ones((cout,), jnp.float32) if var is None else var
    scale = gamma / jnp.sqrt(var + eps)
    bias = beta + (conv_bias - mean) * scale
    return scale.reshape(cout, 1), bias.reshape(cout, 1)


def init_up_params(key, in_ch, out_ch):
    C = in_ch // 2
    k = jax.random.split(key, 6)
    wt = jax.random.normal(k[0], (C, 2, 2, C), jnp.float32) * 0.1   # (ci,p,q,co)
    bt = jax.random.normal(k[1], (C,), jnp.float32) * 0.1
    w1 = jax.random.normal(k[2], (3, 3, in_ch, out_ch), jnp.float32) * 0.1  # HWIO
    b1 = jax.random.normal(k[3], (out_ch,), jnp.float32) * 0.1
    w2 = jax.random.normal(k[4], (3, 3, out_ch, out_ch), jnp.float32) * 0.1
    b2 = jax.random.normal(k[5], (out_ch,), jnp.float32) * 0.1
    s1, fb1 = _fold_bn_eval(b1)
    s2, fb2 = _fold_bn_eval(b2)
    return {"wt": wt, "bt": bt, "w1": w1, "s1": s1, "b1": fb1,
            "w2": w2, "s2": s2, "b2": fb2}


def init_decoder_params(key, topology):
    """Mirrors Decoder.__init__(cfg.MODEL.TOPOLOGY); layers in application
    order (deepest feature first)."""
    n_layers = len(topology)
    up_topo = [topology[0]]
    for idx in range(n_layers):
        is_not_last = idx != n_layers - 1
        up_topo.append(topology[idx + 1] if is_not_last else topology[idx])
    layers = []
    for idx in reversed(range(n_layers)):
        is_not_last = idx != 0
        x1_idx = idx
        x2_idx = idx - 1 if is_not_last else idx
        in_dim = up_topo[x1_idx] * 2
        out_dim = up_topo[x2_idx]
        key, sub = jax.random.split(key)
        layers.append(init_up_params(sub, in_dim, out_dim))
    return layers


def decoder_forward(features_nchw, params):
    """features_nchw: NCHW feature maps, deepest (lowest-res) first, exactly as
    consumed by Decoder.forward.  Returns NCHW float32."""
    x1 = features_nchw[0]
    for idx, p in enumerate(params):
        x1 = up_block(x1, features_nchw[idx + 1], p)
    return x1


# ---------------------------------------------------------------------------
# Pure-JAX reference (lax convs) for a correctness check of the Pallas path.
# ---------------------------------------------------------------------------
def _conv_bn_relu_ref(x, w_hwio, s, b):
    y = lax.conv_general_dilated(x, w_hwio, window_strides=(1, 1),
                                 padding=((1, 1), (1, 1)),
                                 dimension_numbers=("NCHW", "HWIO", "NCHW"))
    y = y * s.reshape(1, -1, 1, 1) + b.reshape(1, -1, 1, 1)
    return jnp.maximum(y, 0.0)


def decoder_forward_ref(features_nchw, params):
    x1 = features_nchw[0]
    for idx, p in enumerate(params):
        x2 = features_nchw[idx + 1]
        up = _pad_or_crop_hw(_conv_transpose_2x2(x1, p["wt"], p["bt"]),
                             x2.shape[2] - 2 * x1.shape[2],
                             x2.shape[3] - 2 * x1.shape[3])
        x = jnp.concatenate([x2, up], axis=1)
        y = _conv_bn_relu_ref(x, p["w1"], p["s1"], p["b1"])
        x1 = _conv_bn_relu_ref(y, p["w2"], p["s2"], p["b2"])
    return x1


if __name__ == "__main__":
    key = jax.random.PRNGKey(0)
    kp, k0, k1, k2 = jax.random.split(key, 4)

    topology = [4, 8]                        # cfg.MODEL.TOPOLOGY
    params = init_decoder_params(kp, topology)

    # Encoder feature pyramid (deepest first) consistent with this Decoder:
    #   up2 = Up(16, 4): x1 = (8ch, 4x4),        skip = (8ch, 8x8)
    #   up1 = Up(8, 4) : x1 = up2 out (4ch, 8x8), skip = (4ch, 16x16)
    N = 2
    f0 = jax.random.normal(k0, (N, 8, 4, 4), jnp.float32)
    f1 = jax.random.normal(k1, (N, 8, 8, 8), jnp.float32)
    f2 = jax.random.normal(k2, (N, 4, 16, 16), jnp.float32)

    y = jax.block_until_ready(decoder_forward([f0, f1, f2], params))
    assert y.shape == (N, 4, 16, 16), y.shape
    assert y.dtype == jnp.float32

    y_ref = decoder_forward_ref([f0, f1, f2], params)
    err = float(jnp.max(jnp.abs(y - y_ref)))
    assert err < 1e-1, f"kernel/reference mismatch: max abs err = {err}"
    print("KERNEL_OK")
</pallas_src>

<mosaic_0001>
module attributes {stable_mosaic.version = 11 : i64} {
  func.func @_up_block_kernel(%arg0: i32, %arg1: memref<9x1x64xf32, #tpu.memory_space<vmem>>, %arg2: memref<1x8x64xbf16, #tpu.memory_space<vmem>>, %arg3: memref<1x8x64xbf16, #tpu.memory_space<vmem>>, %arg4: memref<4x144xbf16, #tpu.memory_space<vmem>>, %arg5: memref<4x1xf32, #tpu.memory_space<vmem>>, %arg6: memref<4x1xf32, #tpu.memory_space<vmem>>, %arg7: memref<4x36xbf16, #tpu.memory_space<vmem>>, %arg8: memref<4x1xf32, #tpu.memory_space<vmem>>, %arg9: memref<4x1xf32, #tpu.memory_space<vmem>>, %arg10: memref<1x4x64xf32, #tpu.memory_space<vmem>>) attributes {dimension_semantics = [#tpu.dimension_semantics<parallel>], iteration_bounds = array<i64: 2>, scalar_prefetch = 0 : i64, scratch_operands = 0 : i64, tpu.core_type = #tpu.core_type<tc>, window_params = [{pipeline_mode = #tpu.pipeline_mode<synchronous>, transform_indices = @transform_0, window_bounds = array<i64: 9, 1, 64>}, {transform_indices = @transform_1, window_bounds = array<i64: 1, 8, 64>}, {transform_indices = @transform_2, window_bounds = array<i64: 1, 8, 64>}, {pipeline_mode = #tpu.pipeline_mode<synchronous>, transform_indices = @transform_3, window_bounds = array<i64: 4, 144>}, {pipeline_mode = #tpu.pipeline_mode<synchronous>, transform_indices = @transform_4, window_bounds = array<i64: 4, 1>}, {pipeline_mode = #tpu.pipeline_mode<synchronous>, transform_indices = @transform_5, window_bounds = array<i64: 4, 1>}, {pipeline_mode = #tpu.pipeline_mode<synchronous>, transform_indices = @transform_6, window_bounds = array<i64: 4, 36>}, {pipeline_mode = #tpu.pipeline_mode<synchronous>, transform_indices = @transform_7, window_bounds = array<i64: 4, 1>}, {pipeline_mode = #tpu.pipeline_mode<synchronous>, transform_indices = @transform_8, window_bounds = array<i64: 4, 1>}, {transform_indices = @transform_9, window_bounds = array<i64: 1, 4, 64>}]} {
    %c0 = arith.constant 0 : index
    %c0_0 = arith.constant 0 : index
    %c0_1 = arith.constant 0 : index
    %0 = vector.load %arg2[%c0, %c0_0, %c0_1] : memref<1x8x64xbf16, #tpu.memory_space<vmem>>, vector<1x8x64xbf16>
    %1 = vector.shape_cast %0 : vector<1x8x64xbf16> to vector<8x64xbf16>
    %2 = arith.extf %1 : vector<8x64xbf16> to vector<8x64xf32>
    %c9_i32 = arith.constant 9 : i32
    %3 = tpu.dynamic_rotate %2 by %c9_i32 dim 1 : vector<8x64xf32>, i32 -> vector<8x64xf32>
    %c0_2 = arith.constant 0 : index
    %c0_3 = arith.constant 0 : index
    %c0_4 = arith.constant 0 : index
    %4 = vector.load %arg1[%c0_2, %c0_3, %c0_4] : memref<9x1x64xf32, #tpu.memory_space<vmem>>, vector<1x1x64xf32>
    %5 = vector.shape_cast %4 : vector<1x1x64xf32> to vector<1x64xf32>
    %6 = vector.broadcast %5 : vector<1x64xf32> to vector<8x64xf32>
    %7 = arith.mulf %3, %6 : vector<8x64xf32>
    %8 = arith.truncf %7 : vector<8x64xf32> to vector<8x64xbf16>
    %c8_i32 = arith.constant 8 : i32
    %9 = tpu.dynamic_rotate %2 by %c8_i32 dim 1 : vector<8x64xf32>, i32 -> vector<8x64xf32>
    %c1 = arith.constant 1 : index
    %c0_5 = arith.constant 0 : index
    %c0_6 = arith.constant 0 : index
    %10 = vector.load %arg1[%c1, %c0_5, %c0_6] : memref<9x1x64xf32, #tpu.memory_space<vmem>>, vector<1x1x64xf32>
    %11 = vector.shape_cast %10 : vector<1x1x64xf32> to vector<1x64xf32>
    %12 = vector.broadcast %11 : vector<1x64xf32> to vector<8x64xf32>
    %13 = arith.mulf %9, %12 : vector<8x64xf32>
    %14 = arith.truncf %13 : vector<8x64xf32> to vector<8x64xbf16>
    %c7_i32 = arith.constant 7 : i32
    %15 = tpu.dynamic_rotate %2 by %c7_i32 dim 1 : vector<8x64xf32>, i32 -> vector<8x64xf32>
    %c2 = arith.constant 2 : index
    %c0_7 = arith.constant 0 : index
    %c0_8 = arith.constant 0 : index
    %16 = vector.load %arg1[%c2, %c0_7, %c0_8] : memref<9x1x64xf32, #tpu.memory_space<vmem>>, vector<1x1x64xf32>
    %17 = vector.shape_cast %16 : vector<1x1x64xf32> to vector<1x64xf32>
    %18 = vector.broadcast %17 : vector<1x64xf32> to vector<8x64xf32>
    %19 = arith.mulf %15, %18 : vector<8x64xf32>
    %20 = arith.truncf %19 : vector<8x64xf32> to vector<8x64xbf16>
    %c1_i32 = arith.constant 1 : i32
    %21 = tpu.dynamic_rotate %2 by %c1_i32 dim 1 : vector<8x64xf32>, i32 -> vector<8x64xf32>
    %c3 = arith.constant 3 : index
    %c0_9 = arith.constant 0 : index
    %c0_10 = arith.constant 0 : index
    %22 = vector.load %arg1[%c3, %c0_9, %c0_10] : memref<9x1x64xf32, #tpu.memory_space<vmem>>, vector<1x1x64xf32>
    %23 = vector.shape_cast %22 : vector<1x1x64xf32> to vector<1x64xf32>
    %24 = vector.broadcast %23 : vector<1x64xf32> to vector<8x64xf32>
    %25 = arith.mulf %21, %24 : vector<8x64xf32>
    %26 = arith.truncf %25 : vector<8x64xf32> to vector<8x64xbf16>
    %c4 = arith.constant 4 : index
    %c0_11 = arith.constant 0 : index
    %c0_12 = arith.constant 0 : index
    %27 = vector.load %arg1[%c4, %c0_11, %c0_12] : memref<9x1x64xf32, #tpu.memory_space<vmem>>, vector<1x1x64xf32>
    %28 = vector.shape_cast %27 : vector<1x1x64xf32> to vector<1x64xf32>
    %29 = vector.broadcast %28 : vector<1x64xf32> to vector<8x64xf32>
    %30 = arith.mulf %2, %29 : vector<8x64xf32>
    %31 = arith.truncf %30 : vector<8x64xf32> to vector<8x64xbf16>
    %c63_i32 = arith.constant 63 : i32
    %32 = tpu.dynamic_rotate %2 by %c63_i32 dim 1 : vector<8x64xf32>, i32 -> vector<8x64xf32>
    %c5 = arith.constant 5 : index
    %c0_13 = arith.constant 0 : index
    %c0_14 = arith.constant 0 : index
    %33 = vector.load %arg1[%c5, %c0_13, %c0_14] : memref<9x1x64xf32, #tpu.memory_space<vmem>>, vector<1x1x64xf32>
    %34 = vector.shape_cast %33 : vector<1x1x64xf32> to vector<1x64xf32>
    %35 = vector.broadcast %34 : vector<1x64xf32> to vector<8x64xf32>
    %36 = arith.mulf %32, %35 : vector<8x64xf32>
    %37 = arith.truncf %36 : vector<8x64xf32> to vector<8x64xbf16>
    %c57_i32 = arith.constant 57 : i32
    %38 = tpu.dynamic_rotate %2 by %c57_i32 dim 1 : vector<8x64xf32>, i32 -> vector<8x64xf32>
    %c6 = arith.constant 6 : index
    %c0_15 = arith.constant 0 : index
    %c0_16 = arith.constant 0 : index
    %39 = vector.load %arg1[%c6, %c0_15, %c0_16] : memref<9x1x64xf32, #tpu.memory_space<vmem>>, vector<1x1x64xf32>
    %40 = vector.shape_cast %39 : vector<1x1x64xf32> to vector<1x64xf32>
    %41 = vector.broadcast %40 : vector<1x64xf32> to vector<8x64xf32>
    %42 = arith.mulf %38, %41 : vector<8x64xf32>
    %43 = arith.truncf %42 : vector<8x64xf32> to vector<8x64xbf16>
    %c56_i32 = arith.constant 56 : i32
    %44 = tpu.dynamic_rotate %2 by %c56_i32 dim 1 : vector<8x64xf32>, i32 -> vector<8x64xf32>
    %c7 = arith.constant 7 : index
    %c0_17 = arith.constant 0 : index
    %c0_18 = arith.constant 0 : index
    %45 = vector.load %arg1[%c7, %c0_17, %c0_18] : memref<9x1x64xf32, #tpu.memory_space<vmem>>, vector<1x1x64xf32>
    %46 = vector.shape_cast %45 : vector<1x1x64xf32> to vector<1x64xf32>
    %47 = vector.broadcast %46 : vector<1x64xf32> to vector<8x64xf32>
    %48 = arith.mulf %44, %47 : vector<8x64xf32>
    %49 = arith.truncf %48 : vector<8x64xf32> to vector<8x64xbf16>
    %c55_i32 = arith.constant 55 : i32
    %50 = tpu.dynamic_rotate %2 by %c55_i32 dim 1 : vector<8x64xf32>, i32 -> vector<8x64xf32>
    %c8 = arith.constant 8 : index
    %c0_19 = arith.constant 0 : index
    %c0_20 = arith.constant 0 : index
    %51 = vector.load %arg1[%c8, %c0_19, %c0_20] : memref<9x1x64xf32, #tpu.memory_space<vmem>>, vector<1x1x64xf32>
    %52 = vector.shape_cast %51 : vector<1x1x64xf32> to vector<1x64xf32>
    %53 = vector.broadcast %52 : vector<1x64xf32> to vector<8x64xf32>
    %54 = arith.mulf %50, %53 : vector<8x64xf32>
    %55 = arith.truncf %54 : vector<8x64xf32> to vector<8x64xbf16>
    %c0_21 = arith.constant 0 : index
    %c0_22 = arith.constant 0 : index
    %c0_23 = arith.constant 0 : index
    %56 = vector.load %arg3[%c0_21, %c0_22, %c0_23] : memref<1x8x64xbf16, #tpu.memory_space<vmem>>, vector<1x8x64xbf16>
    %57 = vector.shape_cast %56 : vector<1x8x64xbf16> to vector<8x64xbf16>
    %58 = arith.extf %57 : vector<8x64xbf16> to vector<8x64xf32>
    %c9_i32_24 = arith.constant 9 : i32
    %59 = tpu.dynamic_rotate %58 by %c9_i32_24 dim 1 : vector<8x64xf32>, i32 -> vector<8x64xf32>
    %c0_25 = arith.constant 0 : index
    %c0_26 = arith.constant 0 : index
    %c0_27 = arith.constant 0 : index
    %60 = vector.load %arg1[%c0_25, %c0_26, %c0_27] : memref<9x1x64xf32, #tpu.memory_space<vmem>>, vector<1x1x64xf32>
    %61 = vector.shape_cast %60 : vector<1x1x64xf32> to vector<1x64xf32>
    %62 = vector.broadcast %61 : vector<1x64xf32> to vector<8x64xf32>
    %63 = arith.mulf %59, %62 : vector<8x64xf32>
    %64 = arith.truncf %63 : vector<8x64xf32> to vector<8x64xbf16>
    %c8_i32_28 = arith.constant 8 : i32
    %65 = tpu.dynamic_rotate %58 by %c8_i32_28 dim 1 : vector<8x64xf32>, i32 -> vector<8x64xf32>
    %c1_29 = arith.constant 1 : index
    %c0_30 = arith.constant 0 : index
    %c0_31 = arith.constant 0 : index
    %66 = vector.load %arg1[%c1_29, %c0_30, %c0_31] : memref<9x1x64xf32, #tpu.memory_space<vmem>>, vector<1x1x64xf32>
    %67 = vector.shape_cast %66 : vector<1x1x64xf32> to vector<1x64xf32>
    %68 = vector.broadcast %67 : vector<1x64xf32> to vector<8x64xf32>
    %69 = arith.mulf %65, %68 : vector<8x64xf32>
    %70 = arith.truncf %69 : vector<8x64xf32> to vector<8x64xbf16>
    %c7_i32_32 = arith.constant 7 : i32
    %71 = tpu.dynamic_rotate %58 by %c7_i32_32 dim 1 : vector<8x64xf32>, i32 -> vector<8x64xf32>
    %c2_33 = arith.constant 2 : index
    %c0_34 = arith.constant 0 : index
    %c0_35 = arith.constant 0 : index
    %72 = vector.load %arg1[%c2_33, %c0_34, %c0_35] : memref<9x1x64xf32, #tpu.memory_space<vmem>>, vector<1x1x64xf32>
    %73 = vector.shape_cast %72 : vector<1x1x64xf32> to vector<1x64xf32>
    %74 = vector.broadcast %73 : vector<1x64xf32> to vector<8x64xf32>
    %75 = arith.mulf %71, %74 : vector<8x64xf32>
    %76 = arith.truncf %75 : vector<8x64xf32> to vector<8x64xbf16>
    %c1_i32_36 = arith.constant 1 : i32
    %77 = tpu.dynamic_rotate %58 by %c1_i32_36 dim 1 : vector<8x64xf32>, i32 -> vector<8x64xf32>
    %c3_37 = arith.constant 3 : index
    %c0_38 = arith.constant 0 : index
    %c0_39 = arith.constant 0 : index
    %78 = vector.load %arg1[%c3_37, %c0_38, %c0_39] : memref<9x1x64xf32, #tpu.memory_space<vmem>>, vector<1x1x64xf32>
    %79 = vector.shape_cast %78 : vector<1x1x64xf32> to vector<1x64xf32>
    %80 = vector.broadcast %79 : vector<1x64xf32> to vector<8x64xf32>
    %81 = arith.mulf %77, %80 : vector<8x64xf32>
    %82 = arith.truncf %81 : vector<8x64xf32> to vector<8x64xbf16>
    %c4_40 = arith.constant 4 : index
    %c0_41 = arith.constant 0 : index
    %c0_42 = arith.constant 0 : index
    %83 = vector.load %arg1[%c4_40, %c0_41, %c0_42] : memref<9x1x64xf32, #tpu.memory_space<vmem>>, vector<1x1x64xf32>
    %84 = vector.shape_cast %83 : vector<1x1x64xf32> to vector<1x64xf32>
    %85 = vector.broadcast %84 : vector<1x64xf32> to vector<8x64xf32>
    %86 = arith.mulf %58, %85 : vector<8x64xf32>
    %87 = arith.truncf %86 : vector<8x64xf32> to vector<8x64xbf16>
    %c63_i32_43 = arith.constant 63 : i32
    %88 = tpu.dynamic_rotate %58 by %c63_i32_43 dim 1 : vector<8x64xf32>, i32 -> vector<8x64xf32>
    %c5_44 = arith.constant 5 : index
    %c0_45 = arith.constant 0 : index
    %c0_46 = arith.constant 0 : index
    %89 = vector.load %arg1[%c5_44, %c0_45, %c0_46] : memref<9x1x64xf32, #tpu.memory_space<vmem>>, vector<1x1x64xf32>
    %90 = vector.shape_cast %89 : vector<1x1x64xf32> to vector<1x64xf32>
    %91 = vector.broadcast %90 : vector<1x64xf32> to vector<8x64xf32>
    %92 = arith.mulf %88, %91 : vector<8x64xf32>
    %93 = arith.truncf %92 : vector<8x64xf32> to vector<8x64xbf16>
    %c57_i32_47 = arith.constant 57 : i32
    %94 = tpu.dynamic_rotate %58 by %c57_i32_47 dim 1 : vector<8x64xf32>, i32 -> vector<8x64xf32>
    %c6_48 = arith.constant 6 : index
    %c0_49 = arith.constant 0 : index
    %c0_50 = arith.constant 0 : index
    %95 = vector.load %arg1[%c6_48, %c0_49, %c0_50] : memref<9x1x64xf32, #tpu.memory_space<vmem>>, vector<1x1x64xf32>
    %96 = vector.shape_cast %95 : vector<1x1x64xf32> to vector<1x64xf32>
    %97 = vector.broadcast %96 : vector<1x64xf32> to vector<8x64xf32>
    %98 = arith.mulf %94, %97 : vector<8x64xf32>
    %99 = arith.truncf %98 : vector<8x64xf32> to vector<8x64xbf16>
    %c56_i32_51 = arith.constant 56 : i32
    %100 = tpu.dynamic_rotate %58 by %c56_i32_51 dim 1 : vector<8x64xf32>, i32 -> vector<8x64xf32>
    %c7_52 = arith.constant 7 : index
    %c0_53 = arith.constant 0 : index
    %c0_54 = arith.constant 0 : index
    %101 = vector.load %arg1[%c7_52, %c0_53, %c0_54] : memref<9x1x64xf32, #tpu.memory_space<vmem>>, vector<1x1x64xf32>
    %102 = vector.shape_cast %101 : vector<1x1x64xf32> to vector<1x64xf32>
    %103 = vector.broadcast %102 : vector<1x64xf32> to vector<8x64xf32>
    %104 = arith.mulf %100, %103 : vector<8x64xf32>
    %105 = arith.truncf %104 : vector<8x64xf32> to vector<8x64xbf16>
    %c55_i32_55 = arith.constant 55 : i32
    %106 = tpu.dynamic_rotate %58 by %c55_i32_55 dim 1 : vector<8x64xf32>, i32 -> vector<8x64xf32>
    %c8_56 = arith.constant 8 : index
    %c0_57 = arith.constant 0 : index
    %c0_58 = arith.constant 0 : index
    %107 = vector.load %arg1[%c8_56, %c0_57, %c0_58] : memref<9x1x64xf32, #tpu.memory_space<vmem>>, vector<1x1x64xf32>
    %108 = vector.shape_cast %107 : vector<1x1x64xf32> to vector<1x64xf32>
    %109 = vector.broadcast %108 : vector<1x64xf32> to vector<8x64xf32>
    %110 = arith.mulf %106, %109 : vector<8x64xf32>
    %111 = arith.truncf %110 : vector<8x64xf32> to vector<8x64xbf16>
    %112 = tpu.concatenate %8, %14, %20, %26, %31, %37, %43, %49, %55, %64, %70, %76, %82, %87, %93, %99 in 0 : vector<8x64xbf16>, vector<8x64xbf16>, vector<8x64xbf16>, vector<8x64xbf16>, vector<8x64xbf16>, vector<8x64xbf16>, vector<8x64xbf16>, vector<8x64xbf16>, vector<8x64xbf16>, vector<8x64xbf16>, vector<8x64xbf16>, vector<8x64xbf16>, vector<8x64xbf16>, vector<8x64xbf16>, vector<8x64xbf16>, vector<8x64xbf16> -> vector<128x64xbf16>
    %113 = tpu.concatenate %105, %111 in 0 : vector<8x64xbf16>, vector<8x64xbf16> -> vector<16x64xbf16>
    %114 = tpu.concatenate %112, %113 in 0 : vector<128x64xbf16>, vector<16x64xbf16> -> vector<144x64xbf16>
    %c0_59 = arith.constant 0 : index
    %c0_60 = arith.constant 0 : index
    %115 = vector.load %arg4[%c0_59, %c0_60] : memref<4x144xbf16, #tpu.memory_space<vmem>>, vector<4x144xbf16>
    %cst = arith.constant dense<0.000000e+00> : vector<4x64xf32>
    %116 = tpu.matmul %115, %114, %cst {dimension_numbers = #tpu.dot_dimension_numbers<[1], [0], [0], [1], [0, 0, 1, 1], [], []>} : vector<4x144xbf16>, vector<144x64xbf16>, vector<4x64xf32> -> vector<4x64xf32>
    %c0_61 = arith.constant 0 : index
    %c0_62 = arith.constant 0 : index
    %117 = vector.load %arg5[%c0_61, %c0_62] : memref<4x1xf32, #tpu.memory_space<vmem>>, vector<4x1xf32>
    %118 = vector.broadcast %117 : vector<4x1xf32> to vector<4x64xf32>
    %119 = arith.mulf %116, %118 : vector<4x64xf32>
    %c0_63 = arith.constant 0 : index
    %c0_64 = arith.constant 0 : index
    %120 = vector.load %arg6[%c0_63, %c0_64] : memref<4x1xf32, #tpu.memory_space<vmem>>, vector<4x1xf32>
    %121 = vector.broadcast %120 : vector<4x1xf32> to vector<4x64xf32>
    %122 = arith.addf %119, %121 : vector<4x64xf32>
    %cst_65 = arith.constant 0.000000e+00 : f32
    %123 = vector.broadcast %cst_65 : f32 to vector<4x64xf32>
    %124 = arith.maximumf %122, %123 : vector<4x64xf32>
    %c9_i32_66 = arith.constant 9 : i32
    %125 = tpu.dynamic_rotate %124 by %c9_i32_66 dim 1 : vector<4x64xf32>, i32 -> vector<4x64xf32>
    %c0_67 = arith.constant 0 : index
    %c0_68 = arith.constant 0 : index
    %c0_69 = arith.constant 0 : index
    %126 = vector.load %arg1[%c0_67, %c0_68, %c0_69] : memref<9x1x64xf32, #tpu.memory_space<vmem>>, vector<1x1x64xf32>
    %127 = vector.shape_cast %126 : vector<1x1x64xf32> to vector<1x64xf32>
    %128 = vector.broadcast %127 : vector<1x64xf32> to vector<4x64xf32>
    %129 = arith.mulf %125, %128 : vector<4x64xf32>
    %130 = arith.truncf %129 : vector<4x64xf32> to vector<4x64xbf16>
    %c8_i32_70 = arith.constant 8 : i32
    %131 = tpu.dynamic_rotate %124 by %c8_i32_70 dim 1 : vector<4x64xf32>, i32 -> vector<4x64xf32>
    %c1_71 = arith.constant 1 : index
    %c0_72 = arith.constant 0 : index
    %c0_73 = arith.constant 0 : index
    %132 = vector.load %arg1[%c1_71, %c0_72, %c0_73] : memref<9x1x64xf32, #tpu.memory_space<vmem>>, vector<1x1x64xf32>
    %133 = vector.shape_cast %132 : vector<1x1x64xf32> to vector<1x64xf32>
    %134 = vector.broadcast %133 : vector<1x64xf32> to vector<4x64xf32>
    %135 = arith.mulf %131, %134 : vector<4x64xf32>
    %136 = arith.truncf %135 : vector<4x64xf32> to vector<4x64xbf16>
    %c7_i32_74 = arith.constant 7 : i32
    %137 = tpu.dynamic_rotate %124 by %c7_i32_74 dim 1 : vector<4x64xf32>, i32 -> vector<4x64xf32>
    %c2_75 = arith.constant 2 : index
    %c0_76 = arith.constant 0 : index
    %c0_77 = arith.constant 0 : index
    %138 = vector.load %arg1[%c2_75, %c0_76, %c0_77] : memref<9x1x64xf32, #tpu.memory_space<vmem>>, vector<1x1x64xf32>
    %139 = vector.shape_cast %138 : vector<1x1x64xf32> to vector<1x64xf32>
    %140 = vector.broadcast %139 : vector<1x64xf32> to vector<4x64xf32>
    %141 = arith.mulf %137, %140 : vector<4x64xf32>
    %142 = arith.truncf %141 : vector<4x64xf32> to vector<4x64xbf16>
    %c1_i32_78 = arith.constant 1 : i32
    %143 = tpu.dynamic_rotate %124 by %c1_i32_78 dim 1 : vector<4x64xf32>, i32 -> vector<4x64xf32>
    %c3_79 = arith.constant 3 : index
    %c0_80 = arith.constant 0 : index
    %c0_81 = arith.constant 0 : index
    %144 = vector.load %arg1[%c3_79, %c0_80, %c0_81] : memref<9x1x64xf32, #tpu.memory_space<vmem>>, vector<1x1x64xf32>
    %145 = vector.shape_cast %144 : vector<1x1x64xf32> to vector<1x64xf32>
    %146 = vector.broadcast %145 : vector<1x64xf32> to vector<4x64xf32>
    %147 = arith.mulf %143, %146 : vector<4x64xf32>
    %148 = arith.truncf %147 : vector<4x64xf32> to vector<4x64xbf16>
    %c4_82 = arith.constant 4 : index
    %c0_83 = arith.constant 0 : index
    %c0_84 = arith.constant 0 : index
    %149 = vector.load %arg1[%c4_82, %c0_83, %c0_84] : memref<9x1x64xf32, #tpu.memory_space<vmem>>, vector<1x1x64xf32>
    %150 = vector.shape_cast %149 : vector<1x1x64xf32> to vector<1x64xf32>
    %151 = vector.broadcast %150 : vector<1x64xf32> to vector<4x64xf32>
    %152 = arith.mulf %124, %151 : vector<4x64xf32>
    %153 = arith.truncf %152 : vector<4x64xf32> to vector<4x64xbf16>
    %c63_i32_85 = arith.constant 63 : i32
    %154 = tpu.dynamic_rotate %124 by %c63_i32_85 dim 1 : vector<4x64xf32>, i32 -> vector<4x64xf32>
    %c5_86 = arith.constant 5 : index
    %c0_87 = arith.constant 0 : index
    %c0_88 = arith.constant 0 : index
    %155 = vector.load %arg1[%c5_86, %c0_87, %c0_88] : memref<9x1x64xf32, #tpu.memory_space<vmem>>, vector<1x1x64xf32>
    %156 = vector.shape_cast %155 : vector<1x1x64xf32> to vector<1x64xf32>
    %157 = vector.broadcast %156 : vector<1x64xf32> to vector<4x64xf32>
    %158 = arith.mulf %154, %157 : vector<4x64xf32>
    %159 = arith.truncf %158 : vector<4x64xf32> to vector<4x64xbf16>
    %c57_i32_89 = arith.constant 57 : i32
    %160 = tpu.dynamic_rotate %124 by %c57_i32_89 dim 1 : vector<4x64xf32>, i32 -> vector<4x64xf32>
    %c6_90 = arith.constant 6 : index
    %c0_91 = arith.constant 0 : index
    %c0_92 = arith.constant 0 : index
    %161 = vector.load %arg1[%c6_90, %c0_91, %c0_92] : memref<9x1x64xf32, #tpu.memory_space<vmem>>, vector<1x1x64xf32>
    %162 = vector.shape_cast %161 : vector<1x1x64xf32> to vector<1x64xf32>
    %163 = vector.broadcast %162 : vector<1x64xf32> to vector<4x64xf32>
    %164 = arith.mulf %160, %163 : vector<4x64xf32>
    %165 = arith.truncf %164 : vector<4x64xf32> to vector<4x64xbf16>
    %c56_i32_93 = arith.constant 56 : i32
    %166 = tpu.dynamic_rotate %124 by %c56_i32_93 dim 1 : vector<4x64xf32>, i32 -> vector<4x64xf32>
    %c7_94 = arith.constant 7 : index
    %c0_95 = arith.constant 0 : index
    %c0_96 = arith.constant 0 : index
    %167 = vector.load %arg1[%c7_94, %c0_95, %c0_96] : memref<9x1x64xf32, #tpu.memory_space<vmem>>, vector<1x1x64xf32>
    %168 = vector.shape_cast %167 : vector<1x1x64xf32> to vector<1x64xf32>
    %169 = vector.broadcast %168 : vector<1x64xf32> to vector<4x64xf32>
    %170 = arith.mulf %166, %169 : vector<4x64xf32>
    %171 = arith.truncf %170 : vector<4x64xf32> to vector<4x64xbf16>
    %c55_i32_97 = arith.constant 55 : i32
    %172 = tpu.dynamic_rotate %124 by %c55_i32_97 dim 1 : vector<4x64xf32>, i32 -> vector<4x64xf32>
    %c8_98 = arith.constant 8 : index
    %c0_99 = arith.constant 0 : index
    %c0_100 = arith.constant 0 : index
    %173 = vector.load %arg1[%c8_98, %c0_99, %c0_100] : memref<9x1x64xf32, #tpu.memory_space<vmem>>, vector<1x1x64xf32>
    %174 = vector.shape_cast %173 : vector<1x1x64xf32> to vector<1x64xf32>
    %175 = vector.broadcast %174 : vector<1x64xf32> to vector<4x64xf32>
    %176 = arith.mulf %172, %175 : vector<4x64xf32>
    %177 = arith.truncf %176 : vector<4x64xf32> to vector<4x64xbf16>
    %178 = tpu.concatenate %130, %136, %142, %148, %153, %159, %165, %171, %177 in 0 : vector<4x64xbf16>, vector<4x64xbf16>, vector<4x64xbf16>, vector<4x64xbf16>, vector<4x64xbf16>, vector<4x64xbf16>, vector<4x64xbf16>, vector<4x64xbf16>, vector<4x64xbf16> -> vector<36x64xbf16>
    %c0_101 = arith.constant 0 : index
    %c0_102 = arith.constant 0 : index
    %179 = vector.load %arg7[%c0_101, %c0_102] : memref<4x36xbf16, #tpu.memory_space<vmem>>, vector<4x36xbf16>
    %cst_103 = arith.constant dense<0.000000e+00> : vector<4x64xf32>
    %180 = tpu.matmul %179, %178, %cst_103 {dimension_numbers = #tpu.dot_dimension_numbers<[1], [0], [0], [1], [0, 0, 1, 1], [], []>} : vector<4x36xbf16>, vector<36x64xbf16>, vector<4x64xf32> -> vector<4x64xf32>
    %c0_104 = arith.constant 0 : index
    %c0_105 = arith.constant 0 : index
    %181 = vector.load %arg8[%c0_104, %c0_105] : memref<4x1xf32, #tpu.memory_space<vmem>>, vector<4x1xf32>
    %182 = vector.broadcast %181 : vector<4x1xf32> to vector<4x64xf32>
    %183 = arith.mulf %180, %182 : vector<4x64xf32>
    %c0_106 = arith.constant 0 : index
    %c0_107 = arith.constant 0 : index
    %184 = vector.load %arg9[%c0_106, %c0_107] : memref<4x1xf32, #tpu.memory_space<vmem>>, vector<4x1xf32>
    %185 = vector.broadcast %184 : vector<4x1xf32> to vector<4x64xf32>
    %186 = arith.addf %183, %185 : vector<4x64xf32>
    %cst_108 = arith.constant 0.000000e+00 : f32
    %187 = vector.broadcast %cst_108 : f32 to vector<4x64xf32>
    %188 = arith.maximumf %186, %187 : vector<4x64xf32>
    %c0_109 = arith.constant 0 : index
    %c0_110 = arith.constant 0 : index
    %c0_111 = arith.constant 0 : index
    %189 = vector.load %arg10[%c0_109, %c0_110, %c0_111] : memref<1x4x64xf32, #tpu.memory_space<vmem>>, vector<1x4x64xf32>
    %190 = vector.shape_cast %189 : vector<1x4x64xf32> to vector<4x64xf32>
    %191 = vector.shape_cast %188 : vector<4x64xf32> to vector<1x4x64xf32>
    tpu.vector_store %arg10[%c0_109, %c0_110, %c0_111], %191 {strides = array<i32>} : memref<1x4x64xf32, #tpu.memory_space<vmem>>, vector<1x4x64xf32>,
    return
  }
  func.func @transform_0(%arg0: i32) -> (i32, i32, i32) {
    %c0_i32 = arith.constant 0 : i32
    %c0_i32_0 = arith.constant 0 : i32
    %c0_i32_1 = arith.constant 0 : i32
    %c0_i32_2 = arith.constant 0 : i32
    return %c0_i32, %c0_i32_0, %c0_i32_1 : i32, i32, i32
  }
  func.func @transform_1(%arg0: i32) -> (i32, i32, i32) {
    %c0_i32 = arith.constant 0 : i32
    %c0_i32_0 = arith.constant 0 : i32
    %c0_i32_1 = arith.constant 0 : i32
    return %arg0, %c0_i32, %c0_i32_0 : i32, i32, i32
  }
  func.func @transform_2(%arg0: i32) -> (i32, i32, i32) {
    %c0_i32 = arith.constant 0 : i32
    %c0_i32_0 = arith.constant 0 : i32
    %c0_i32_1 = arith.constant 0 : i32
    return %arg0, %c0_i32, %c0_i32_0 : i32, i32, i32
  }
  func.func @transform_3(%arg0: i32) -> (i32, i32) {
    %c0_i32 = arith.constant 0 : i32
    %c0_i32_0 = arith.constant 0 : i32
    %c0_i32_1 = arith.constant 0 : i32
    return %c0_i32, %c0_i32_0 : i32, i32
  }
  func.func @transform_4(%arg0: i32) -> (i32, i32) {
    %c0_i32 = arith.constant 0 : i32
    %c0_i32_0 = arith.constant 0 : i32
    %c0_i32_1 = arith.constant 0 : i32
    return %c0_i32, %c0_i32_0 : i32, i32
  }
  func.func @transform_5(%arg0: i32) -> (i32, i32) {
    %c0_i32 = arith.constant 0 : i32
    %c0_i32_0 = arith.constant 0 : i32
    %c0_i32_1 = arith.constant 0 : i32
    return %c0_i32, %c0_i32_0 : i32, i32
  }
  func.func @transform_6(%arg0: i32) -> (i32, i32) {
    %c0_i32 = arith.constant 0 : i32
    %c0_i32_0 = arith.constant 0 : i32
    %c0_i32_1 = arith.constant 0 : i32
    return %c0_i32, %c0_i32_0 : i32, i32
  }
  func.func @transform_7(%arg0: i32) -> (i32, i32) {
    %c0_i32 = arith.constant 0 : i32
    %c0_i32_0 = arith.constant 0 : i32
    %c0_i32_1 = arith.constant 0 : i32
    return %c0_i32, %c0_i32_0 : i32, i32
  }
  func.func @transform_8(%arg0: i32) -> (i32, i32) {
    %c0_i32 = arith.constant 0 : i32
    %c0_i32_0 = arith.constant 0 : i32
    %c0_i32_1 = arith.constant 0 : i32
    return %c0_i32, %c0_i32_0 : i32, i32
  }
  func.func @transform_9(%arg0: i32) -> (i32, i32, i32) {
    %c0_i32 = arith.constant 0 : i32
    %c0_i32_0 = arith.constant 0 : i32
    %c0_i32_1 = arith.constant 0 : i32
    return %arg0, %c0_i32, %c0_i32_0 : i32, i32, i32
  }
}

module attributes {stable_mosaic.version = 11 : i64} {
  func.func @_up_block_kernel(%arg0: i32, %arg1: memref<9x1x64xf32, #tpu.memory_space<vmem>>, %arg2: memref<1x8x64xbf16, #tpu.memory_space<vmem>>, %arg3: memref<1x8x64xbf16, #tpu.memory_space<vmem>>, %arg4: memref<18x4x8xbf16, #tpu.memory_space<vmem>>, %arg5: memref<4x1xf32, #tpu.memory_space<vmem>>, %arg6: memref<4x1xf32, #tpu.memory_space<vmem>>, %arg7: memref<9x4x4xbf16, #tpu.memory_space<vmem>>, %arg8: memref<4x1xf32, #tpu.memory_space<vmem>>, %arg9: memref<4x1xf32, #tpu.memory_space<vmem>>, %arg10: memref<1x4x64xf32, #tpu.memory_space<vmem>>) attributes {dimension_semantics = [#tpu.dimension_semantics<parallel>], iteration_bounds = array<i64: 2>, scalar_prefetch = 0 : i64, scratch_operands = 0 : i64, tpu.core_type = #tpu.core_type<tc>, window_params = [{pipeline_mode = #tpu.pipeline_mode<synchronous>, transform_indices = @transform_0, window_bounds = array<i64: 9, 1, 64>}, {transform_indices = @transform_1, window_bounds = array<i64: 1, 8, 64>}, {transform_indices = @transform_2, window_bounds = array<i64: 1, 8, 64>}, {pipeline_mode = #tpu.pipeline_mode<synchronous>, transform_indices = @transform_3, window_bounds = array<i64: 18, 4, 8>}, {pipeline_mode = #tpu.pipeline_mode<synchronous>, transform_indices = @transform_4, window_bounds = array<i64: 4, 1>}, {pipeline_mode = #tpu.pipeline_mode<synchronous>, transform_indices = @transform_5, window_bounds = array<i64: 4, 1>}, {pipeline_mode = #tpu.pipeline_mode<synchronous>, transform_indices = @transform_6, window_bounds = array<i64: 9, 4, 4>}, {pipeline_mode = #tpu.pipeline_mode<synchronous>, transform_indices = @transform_7, window_bounds = array<i64: 4, 1>}, {pipeline_mode = #tpu.pipeline_mode<synchronous>, transform_indices = @transform_8, window_bounds = array<i64: 4, 1>}, {transform_indices = @transform_9, window_bounds = array<i64: 1, 4, 64>}]} {
    %c0 = arith.constant 0 : index
    %c0_0 = arith.constant 0 : index
    %c0_1 = arith.constant 0 : index
    %0 = vector.load %arg2[%c0, %c0_0, %c0_1] : memref<1x8x64xbf16, #tpu.memory_space<vmem>>, vector<1x8x64xbf16>
    %1 = vector.shape_cast %0 : vector<1x8x64xbf16> to vector<8x64xbf16>
    %2 = arith.extf %1 : vector<8x64xbf16> to vector<8x64xf32>
    %c9_i32 = arith.constant 9 : i32
    %3 = tpu.dynamic_rotate %2 by %c9_i32 dim 1 : vector<8x64xf32>, i32 -> vector<8x64xf32>
    %c0_2 = arith.constant 0 : index
    %c0_3 = arith.constant 0 : index
    %c0_4 = arith.constant 0 : index
    %4 = vector.load %arg1[%c0_2, %c0_3, %c0_4] : memref<9x1x64xf32, #tpu.memory_space<vmem>>, vector<1x1x64xf32>
    %5 = vector.shape_cast %4 : vector<1x1x64xf32> to vector<1x64xf32>
    %6 = vector.broadcast %5 : vector<1x64xf32> to vector<8x64xf32>
    %7 = arith.mulf %3, %6 : vector<8x64xf32>
    %8 = arith.truncf %7 : vector<8x64xf32> to vector<8x64xbf16>
    %c8_i32 = arith.constant 8 : i32
    %9 = tpu.dynamic_rotate %2 by %c8_i32 dim 1 : vector<8x64xf32>, i32 -> vector<8x64xf32>
    %c1 = arith.constant 1 : index
    %c0_5 = arith.constant 0 : index
    %c0_6 = arith.constant 0 : index
    %10 = vector.load %arg1[%c1, %c0_5, %c0_6] : memref<9x1x64xf32, #tpu.memory_space<vmem>>, vector<1x1x64xf32>
    %11 = vector.shape_cast %10 : vector<1x1x64xf32> to vector<1x64xf32>
    %12 = vector.broadcast %11 : vector<1x64xf32> to vector<8x64xf32>
    %13 = arith.mulf %9, %12 : vector<8x64xf32>
    %14 = arith.truncf %13 : vector<8x64xf32> to vector<8x64xbf16>
    %c7_i32 = arith.constant 7 : i32
    %15 = tpu.dynamic_rotate %2 by %c7_i32 dim 1 : vector<8x64xf32>, i32 -> vector<8x64xf32>
    %c2 = arith.constant 2 : index
    %c0_7 = arith.constant 0 : index
    %c0_8 = arith.constant 0 : index
    %16 = vector.load %arg1[%c2, %c0_7, %c0_8] : memref<9x1x64xf32, #tpu.memory_space<vmem>>, vector<1x1x64xf32>
    %17 = vector.shape_cast %16 : vector<1x1x64xf32> to vector<1x64xf32>
    %18 = vector.broadcast %17 : vector<1x64xf32> to vector<8x64xf32>
    %19 = arith.mulf %15, %18 : vector<8x64xf32>
    %20 = arith.truncf %19 : vector<8x64xf32> to vector<8x64xbf16>
    %c1_i32 = arith.constant 1 : i32
    %21 = tpu.dynamic_rotate %2 by %c1_i32 dim 1 : vector<8x64xf32>, i32 -> vector<8x64xf32>
    %c3 = arith.constant 3 : index
    %c0_9 = arith.constant 0 : index
    %c0_10 = arith.constant 0 : index
    %22 = vector.load %arg1[%c3, %c0_9, %c0_10] : memref<9x1x64xf32, #tpu.memory_space<vmem>>, vector<1x1x64xf32>
    %23 = vector.shape_cast %22 : vector<1x1x64xf32> to vector<1x64xf32>
    %24 = vector.broadcast %23 : vector<1x64xf32> to vector<8x64xf32>
    %25 = arith.mulf %21, %24 : vector<8x64xf32>
    %26 = arith.truncf %25 : vector<8x64xf32> to vector<8x64xbf16>
    %c4 = arith.constant 4 : index
    %c0_11 = arith.constant 0 : index
    %c0_12 = arith.constant 0 : index
    %27 = vector.load %arg1[%c4, %c0_11, %c0_12] : memref<9x1x64xf32, #tpu.memory_space<vmem>>, vector<1x1x64xf32>
    %28 = vector.shape_cast %27 : vector<1x1x64xf32> to vector<1x64xf32>
    %29 = vector.broadcast %28 : vector<1x64xf32> to vector<8x64xf32>
    %30 = arith.mulf %2, %29 : vector<8x64xf32>
    %31 = arith.truncf %30 : vector<8x64xf32> to vector<8x64xbf16>
    %c63_i32 = arith.constant 63 : i32
    %32 = tpu.dynamic_rotate %2 by %c63_i32 dim 1 : vector<8x64xf32>, i32 -> vector<8x64xf32>
    %c5 = arith.constant 5 : index
    %c0_13 = arith.constant 0 : index
    %c0_14 = arith.constant 0 : index
    %33 = vector.load %arg1[%c5, %c0_13, %c0_14] : memref<9x1x64xf32, #tpu.memory_space<vmem>>, vector<1x1x64xf32>
    %34 = vector.shape_cast %33 : vector<1x1x64xf32> to vector<1x64xf32>
    %35 = vector.broadcast %34 : vector<1x64xf32> to vector<8x64xf32>
    %36 = arith.mulf %32, %35 : vector<8x64xf32>
    %37 = arith.truncf %36 : vector<8x64xf32> to vector<8x64xbf16>
    %c57_i32 = arith.constant 57 : i32
    %38 = tpu.dynamic_rotate %2 by %c57_i32 dim 1 : vector<8x64xf32>, i32 -> vector<8x64xf32>
    %c6 = arith.constant 6 : index
    %c0_15 = arith.constant 0 : index
    %c0_16 = arith.constant 0 : index
    %39 = vector.load %arg1[%c6, %c0_15, %c0_16] : memref<9x1x64xf32, #tpu.memory_space<vmem>>, vector<1x1x64xf32>
    %40 = vector.shape_cast %39 : vector<1x1x64xf32> to vector<1x64xf32>
    %41 = vector.broadcast %40 : vector<1x64xf32> to vector<8x64xf32>
    %42 = arith.mulf %38, %41 : vector<8x64xf32>
    %43 = arith.truncf %42 : vector<8x64xf32> to vector<8x64xbf16>
    %c56_i32 = arith.constant 56 : i32
    %44 = tpu.dynamic_rotate %2 by %c56_i32 dim 1 : vector<8x64xf32>, i32 -> vector<8x64xf32>
    %c7 = arith.constant 7 : index
    %c0_17 = arith.constant 0 : index
    %c0_18 = arith.constant 0 : index
    %45 = vector.load %arg1[%c7, %c0_17, %c0_18] : memref<9x1x64xf32, #tpu.memory_space<vmem>>, vector<1x1x64xf32>
    %46 = vector.shape_cast %45 : vector<1x1x64xf32> to vector<1x64xf32>
    %47 = vector.broadcast %46 : vector<1x64xf32> to vector<8x64xf32>
    %48 = arith.mulf %44, %47 : vector<8x64xf32>
    %49 = arith.truncf %48 : vector<8x64xf32> to vector<8x64xbf16>
    %c55_i32 = arith.constant 55 : i32
    %50 = tpu.dynamic_rotate %2 by %c55_i32 dim 1 : vector<8x64xf32>, i32 -> vector<8x64xf32>
    %c8 = arith.constant 8 : index
    %c0_19 = arith.constant 0 : index
    %c0_20 = arith.constant 0 : index
    %51 = vector.load %arg1[%c8, %c0_19, %c0_20] : memref<9x1x64xf32, #tpu.memory_space<vmem>>, vector<1x1x64xf32>
    %52 = vector.shape_cast %51 : vector<1x1x64xf32> to vector<1x64xf32>
    %53 = vector.broadcast %52 : vector<1x64xf32> to vector<8x64xf32>
    %54 = arith.mulf %50, %53 : vector<8x64xf32>
    %55 = arith.truncf %54 : vector<8x64xf32> to vector<8x64xbf16>
    %c0_21 = arith.constant 0 : index
    %c0_22 = arith.constant 0 : index
    %c0_23 = arith.constant 0 : index
    %56 = vector.load %arg3[%c0_21, %c0_22, %c0_23] : memref<1x8x64xbf16, #tpu.memory_space<vmem>>, vector<1x8x64xbf16>
    %57 = vector.shape_cast %56 : vector<1x8x64xbf16> to vector<8x64xbf16>
    %58 = arith.extf %57 : vector<8x64xbf16> to vector<8x64xf32>
    %c9_i32_24 = arith.constant 9 : i32
    %59 = tpu.dynamic_rotate %58 by %c9_i32_24 dim 1 : vector<8x64xf32>, i32 -> vector<8x64xf32>
    %c0_25 = arith.constant 0 : index
    %c0_26 = arith.constant 0 : index
    %c0_27 = arith.constant 0 : index
    %60 = vector.load %arg1[%c0_25, %c0_26, %c0_27] : memref<9x1x64xf32, #tpu.memory_space<vmem>>, vector<1x1x64xf32>
    %61 = vector.shape_cast %60 : vector<1x1x64xf32> to vector<1x64xf32>
    %62 = vector.broadcast %61 : vector<1x64xf32> to vector<8x64xf32>
    %63 = arith.mulf %59, %62 : vector<8x64xf32>
    %64 = arith.truncf %63 : vector<8x64xf32> to vector<8x64xbf16>
    %c8_i32_28 = arith.constant 8 : i32
    %65 = tpu.dynamic_rotate %58 by %c8_i32_28 dim 1 : vector<8x64xf32>, i32 -> vector<8x64xf32>
    %c1_29 = arith.constant 1 : index
    %c0_30 = arith.constant 0 : index
    %c0_31 = arith.constant 0 : index
    %66 = vector.load %arg1[%c1_29, %c0_30, %c0_31] : memref<9x1x64xf32, #tpu.memory_space<vmem>>, vector<1x1x64xf32>
    %67 = vector.shape_cast %66 : vector<1x1x64xf32> to vector<1x64xf32>
    %68 = vector.broadcast %67 : vector<1x64xf32> to vector<8x64xf32>
    %69 = arith.mulf %65, %68 : vector<8x64xf32>
    %70 = arith.truncf %69 : vector<8x64xf32> to vector<8x64xbf16>
    %c7_i32_32 = arith.constant 7 : i32
    %71 = tpu.dynamic_rotate %58 by %c7_i32_32 dim 1 : vector<8x64xf32>, i32 -> vector<8x64xf32>
    %c2_33 = arith.constant 2 : index
    %c0_34 = arith.constant 0 : index
    %c0_35 = arith.constant 0 : index
    %72 = vector.load %arg1[%c2_33, %c0_34, %c0_35] : memref<9x1x64xf32, #tpu.memory_space<vmem>>, vector<1x1x64xf32>
    %73 = vector.shape_cast %72 : vector<1x1x64xf32> to vector<1x64xf32>
    %74 = vector.broadcast %73 : vector<1x64xf32> to vector<8x64xf32>
    %75 = arith.mulf %71, %74 : vector<8x64xf32>
    %76 = arith.truncf %75 : vector<8x64xf32> to vector<8x64xbf16>
    %c1_i32_36 = arith.constant 1 : i32
    %77 = tpu.dynamic_rotate %58 by %c1_i32_36 dim 1 : vector<8x64xf32>, i32 -> vector<8x64xf32>
    %c3_37 = arith.constant 3 : index
    %c0_38 = arith.constant 0 : index
    %c0_39 = arith.constant 0 : index
    %78 = vector.load %arg1[%c3_37, %c0_38, %c0_39] : memref<9x1x64xf32, #tpu.memory_space<vmem>>, vector<1x1x64xf32>
    %79 = vector.shape_cast %78 : vector<1x1x64xf32> to vector<1x64xf32>
    %80 = vector.broadcast %79 : vector<1x64xf32> to vector<8x64xf32>
    %81 = arith.mulf %77, %80 : vector<8x64xf32>
    %82 = arith.truncf %81 : vector<8x64xf32> to vector<8x64xbf16>
    %c4_40 = arith.constant 4 : index
    %c0_41 = arith.constant 0 : index
    %c0_42 = arith.constant 0 : index
    %83 = vector.load %arg1[%c4_40, %c0_41, %c0_42] : memref<9x1x64xf32, #tpu.memory_space<vmem>>, vector<1x1x64xf32>
    %84 = vector.shape_cast %83 : vector<1x1x64xf32> to vector<1x64xf32>
    %85 = vector.broadcast %84 : vector<1x64xf32> to vector<8x64xf32>
    %86 = arith.mulf %58, %85 : vector<8x64xf32>
    %87 = arith.truncf %86 : vector<8x64xf32> to vector<8x64xbf16>
    %c63_i32_43 = arith.constant 63 : i32
    %88 = tpu.dynamic_rotate %58 by %c63_i32_43 dim 1 : vector<8x64xf32>, i32 -> vector<8x64xf32>
    %c5_44 = arith.constant 5 : index
    %c0_45 = arith.constant 0 : index
    %c0_46 = arith.constant 0 : index
    %89 = vector.load %arg1[%c5_44, %c0_45, %c0_46] : memref<9x1x64xf32, #tpu.memory_space<vmem>>, vector<1x1x64xf32>
    %90 = vector.shape_cast %89 : vector<1x1x64xf32> to vector<1x64xf32>
    %91 = vector.broadcast %90 : vector<1x64xf32> to vector<8x64xf32>
    %92 = arith.mulf %88, %91 : vector<8x64xf32>
    %93 = arith.truncf %92 : vector<8x64xf32> to vector<8x64xbf16>
    %c57_i32_47 = arith.constant 57 : i32
    %94 = tpu.dynamic_rotate %58 by %c57_i32_47 dim 1 : vector<8x64xf32>, i32 -> vector<8x64xf32>
    %c6_48 = arith.constant 6 : index
    %c0_49 = arith.constant 0 : index
    %c0_50 = arith.constant 0 : index
    %95 = vector.load %arg1[%c6_48, %c0_49, %c0_50] : memref<9x1x64xf32, #tpu.memory_space<vmem>>, vector<1x1x64xf32>
    %96 = vector.shape_cast %95 : vector<1x1x64xf32> to vector<1x64xf32>
    %97 = vector.broadcast %96 : vector<1x64xf32> to vector<8x64xf32>
    %98 = arith.mulf %94, %97 : vector<8x64xf32>
    %99 = arith.truncf %98 : vector<8x64xf32> to vector<8x64xbf16>
    %c56_i32_51 = arith.constant 56 : i32
    %100 = tpu.dynamic_rotate %58 by %c56_i32_51 dim 1 : vector<8x64xf32>, i32 -> vector<8x64xf32>
    %c7_52 = arith.constant 7 : index
    %c0_53 = arith.constant 0 : index
    %c0_54 = arith.constant 0 : index
    %101 = vector.load %arg1[%c7_52, %c0_53, %c0_54] : memref<9x1x64xf32, #tpu.memory_space<vmem>>, vector<1x1x64xf32>
    %102 = vector.shape_cast %101 : vector<1x1x64xf32> to vector<1x64xf32>
    %103 = vector.broadcast %102 : vector<1x64xf32> to vector<8x64xf32>
    %104 = arith.mulf %100, %103 : vector<8x64xf32>
    %105 = arith.truncf %104 : vector<8x64xf32> to vector<8x64xbf16>
    %c55_i32_55 = arith.constant 55 : i32
    %106 = tpu.dynamic_rotate %58 by %c55_i32_55 dim 1 : vector<8x64xf32>, i32 -> vector<8x64xf32>
    %c8_56 = arith.constant 8 : index
    %c0_57 = arith.constant 0 : index
    %c0_58 = arith.constant 0 : index
    %107 = vector.load %arg1[%c8_56, %c0_57, %c0_58] : memref<9x1x64xf32, #tpu.memory_space<vmem>>, vector<1x1x64xf32>
    %108 = vector.shape_cast %107 : vector<1x1x64xf32> to vector<1x64xf32>
    %109 = vector.broadcast %108 : vector<1x64xf32> to vector<8x64xf32>
    %110 = arith.mulf %106, %109 : vector<8x64xf32>
    %111 = arith.truncf %110 : vector<8x64xf32> to vector<8x64xbf16>
    %c0_59 = arith.constant 0 : index
    %c0_60 = arith.constant 0 : index
    %c0_61 = arith.constant 0 : index
    %112 = vector.load %arg4[%c0_59, %c0_60, %c0_61] : memref<18x4x8xbf16, #tpu.memory_space<vmem>>, vector<1x4x8xbf16>
    %113 = vector.shape_cast %112 : vector<1x4x8xbf16> to vector<4x8xbf16>
    %cst = arith.constant dense<0.000000e+00> : vector<4x64xf32>
    %114 = tpu.matmul %113, %8, %cst {dimension_numbers = #tpu.dot_dimension_numbers<[1], [0], [0], [1], [0, 0, 1, 1], [], []>} : vector<4x8xbf16>, vector<8x64xbf16>, vector<4x64xf32> -> vector<4x64xf32>
    %c1_62 = arith.constant 1 : index
    %c0_63 = arith.constant 0 : index
    %c0_64 = arith.constant 0 : index
    %115 = vector.load %arg4[%c1_62, %c0_63, %c0_64] : memref<18x4x8xbf16, #tpu.memory_space<vmem>>, vector<1x4x8xbf16>
    %116 = vector.shape_cast %115 : vector<1x4x8xbf16> to vector<4x8xbf16>
    %cst_65 = arith.constant dense<0.000000e+00> : vector<4x64xf32>
    %117 = tpu.matmul %116, %14, %cst_65 {dimension_numbers = #tpu.dot_dimension_numbers<[1], [0], [0], [1], [0, 0, 1, 1], [], []>} : vector<4x8xbf16>, vector<8x64xbf16>, vector<4x64xf32> -> vector<4x64xf32>
    %118 = arith.addf %114, %117 : vector<4x64xf32>
    %c2_66 = arith.constant 2 : index
    %c0_67 = arith.constant 0 : index
    %c0_68 = arith.constant 0 : index
    %119 = vector.load %arg4[%c2_66, %c0_67, %c0_68] : memref<18x4x8xbf16, #tpu.memory_space<vmem>>, vector<1x4x8xbf16>
    %120 = vector.shape_cast %119 : vector<1x4x8xbf16> to vector<4x8xbf16>
    %cst_69 = arith.constant dense<0.000000e+00> : vector<4x64xf32>
    %121 = tpu.matmul %120, %20, %cst_69 {dimension_numbers = #tpu.dot_dimension_numbers<[1], [0], [0], [1], [0, 0, 1, 1], [], []>} : vector<4x8xbf16>, vector<8x64xbf16>, vector<4x64xf32> -> vector<4x64xf32>
    %122 = arith.addf %118, %121 : vector<4x64xf32>
    %c3_70 = arith.constant 3 : index
    %c0_71 = arith.constant 0 : index
    %c0_72 = arith.constant 0 : index
    %123 = vector.load %arg4[%c3_70, %c0_71, %c0_72] : memref<18x4x8xbf16, #tpu.memory_space<vmem>>, vector<1x4x8xbf16>
    %124 = vector.shape_cast %123 : vector<1x4x8xbf16> to vector<4x8xbf16>
    %cst_73 = arith.constant dense<0.000000e+00> : vector<4x64xf32>
    %125 = tpu.matmul %124, %26, %cst_73 {dimension_numbers = #tpu.dot_dimension_numbers<[1], [0], [0], [1], [0, 0, 1, 1], [], []>} : vector<4x8xbf16>, vector<8x64xbf16>, vector<4x64xf32> -> vector<4x64xf32>
    %126 = arith.addf %122, %125 : vector<4x64xf32>
    %c4_74 = arith.constant 4 : index
    %c0_75 = arith.constant 0 : index
    %c0_76 = arith.constant 0 : index
    %127 = vector.load %arg4[%c4_74, %c0_75, %c0_76] : memref<18x4x8xbf16, #tpu.memory_space<vmem>>, vector<1x4x8xbf16>
    %128 = vector.shape_cast %127 : vector<1x4x8xbf16> to vector<4x8xbf16>
    %cst_77 = arith.constant dense<0.000000e+00> : vector<4x64xf32>
    %129 = tpu.matmul %128, %31, %cst_77 {dimension_numbers = #tpu.dot_dimension_numbers<[1], [0], [0], [1], [0, 0, 1, 1], [], []>} : vector<4x8xbf16>, vector<8x64xbf16>, vector<4x64xf32> -> vector<4x64xf32>
    %130 = arith.addf %126, %129 : vector<4x64xf32>
    %c5_78 = arith.constant 5 : index
    %c0_79 = arith.constant 0 : index
    %c0_80 = arith.constant 0 : index
    %131 = vector.load %arg4[%c5_78, %c0_79, %c0_80] : memref<18x4x8xbf16, #tpu.memory_space<vmem>>, vector<1x4x8xbf16>
    %132 = vector.shape_cast %131 : vector<1x4x8xbf16> to vector<4x8xbf16>
    %cst_81 = arith.constant dense<0.000000e+00> : vector<4x64xf32>
    %133 = tpu.matmul %132, %37, %cst_81 {dimension_numbers = #tpu.dot_dimension_numbers<[1], [0], [0], [1], [0, 0, 1, 1], [], []>} : vector<4x8xbf16>, vector<8x64xbf16>, vector<4x64xf32> -> vector<4x64xf32>
    %134 = arith.addf %130, %133 : vector<4x64xf32>
    %c6_82 = arith.constant 6 : index
    %c0_83 = arith.constant 0 : index
    %c0_84 = arith.constant 0 : index
    %135 = vector.load %arg4[%c6_82, %c0_83, %c0_84] : memref<18x4x8xbf16, #tpu.memory_space<vmem>>, vector<1x4x8xbf16>
    %136 = vector.shape_cast %135 : vector<1x4x8xbf16> to vector<4x8xbf16>
    %cst_85 = arith.constant dense<0.000000e+00> : vector<4x64xf32>
    %137 = tpu.matmul %136, %43, %cst_85 {dimension_numbers = #tpu.dot_dimension_numbers<[1], [0], [0], [1], [0, 0, 1, 1], [], []>} : vector<4x8xbf16>, vector<8x64xbf16>, vector<4x64xf32> -> vector<4x64xf32>
    %138 = arith.addf %134, %137 : vector<4x64xf32>
    %c7_86 = arith.constant 7 : index
    %c0_87 = arith.constant 0 : index
    %c0_88 = arith.constant 0 : index
    %139 = vector.load %arg4[%c7_86, %c0_87, %c0_88] : memref<18x4x8xbf16, #tpu.memory_space<vmem>>, vector<1x4x8xbf16>
    %140 = vector.shape_cast %139 : vector<1x4x8xbf16> to vector<4x8xbf16>
    %cst_89 = arith.constant dense<0.000000e+00> : vector<4x64xf32>
    %141 = tpu.matmul %140, %49, %cst_89 {dimension_numbers = #tpu.dot_dimension_numbers<[1], [0], [0], [1], [0, 0, 1, 1], [], []>} : vector<4x8xbf16>, vector<8x64xbf16>, vector<4x64xf32> -> vector<4x64xf32>
    %142 = arith.addf %138, %141 : vector<4x64xf32>
    %c8_90 = arith.constant 8 : index
    %c0_91 = arith.constant 0 : index
    %c0_92 = arith.constant 0 : index
    %143 = vector.load %arg4[%c8_90, %c0_91, %c0_92] : memref<18x4x8xbf16, #tpu.memory_space<vmem>>, vector<1x4x8xbf16>
    %144 = vector.shape_cast %143 : vector<1x4x8xbf16> to vector<4x8xbf16>
    %cst_93 = arith.constant dense<0.000000e+00> : vector<4x64xf32>
    %145 = tpu.matmul %144, %55, %cst_93 {dimension_numbers = #tpu.dot_dimension_numbers<[1], [0], [0], [1], [0, 0, 1, 1], [], []>} : vector<4x8xbf16>, vector<8x64xbf16>, vector<4x64xf32> -> vector<4x64xf32>
    %146 = arith.addf %142, %145 : vector<4x64xf32>
    %c9 = arith.constant 9 : index
    %c0_94 = arith.constant 0 : index
    %c0_95 = arith.constant 0 : index
    %147 = vector.load %arg4[%c9, %c0_94, %c0_95] : memref<18x4x8xbf16, #tpu.memory_space<vmem>>, vector<1x4x8xbf16>
    %148 = vector.shape_cast %147 : vector<1x4x8xbf16> to vector<4x8xbf16>
    %cst_96 = arith.constant dense<0.000000e+00> : vector<4x64xf32>
    %149 = tpu.matmul %148, %64, %cst_96 {dimension_numbers = #tpu.dot_dimension_numbers<[1], [0], [0], [1], [0, 0, 1, 1], [], []>} : vector<4x8xbf16>, vector<8x64xbf16>, vector<4x64xf32> -> vector<4x64xf32>
    %150 = arith.addf %146, %149 : vector<4x64xf32>
    %c10 = arith.constant 10 : index
    %c0_97 = arith.constant 0 : index
    %c0_98 = arith.constant 0 : index
    %151 = vector.load %arg4[%c10, %c0_97, %c0_98] : memref<18x4x8xbf16, #tpu.memory_space<vmem>>, vector<1x4x8xbf16>
    %152 = vector.shape_cast %151 : vector<1x4x8xbf16> to vector<4x8xbf16>
    %cst_99 = arith.constant dense<0.000000e+00> : vector<4x64xf32>
    %153 = tpu.matmul %152, %70, %cst_99 {dimension_numbers = #tpu.dot_dimension_numbers<[1], [0], [0], [1], [0, 0, 1, 1], [], []>} : vector<4x8xbf16>, vector<8x64xbf16>, vector<4x64xf32> -> vector<4x64xf32>
    %154 = arith.addf %150, %153 : vector<4x64xf32>
    %c11 = arith.constant 11 : index
    %c0_100 = arith.constant 0 : index
    %c0_101 = arith.constant 0 : index
    %155 = vector.load %arg4[%c11, %c0_100, %c0_101] : memref<18x4x8xbf16, #tpu.memory_space<vmem>>, vector<1x4x8xbf16>
    %156 = vector.shape_cast %155 : vector<1x4x8xbf16> to vector<4x8xbf16>
    %cst_102 = arith.constant dense<0.000000e+00> : vector<4x64xf32>
    %157 = tpu.matmul %156, %76, %cst_102 {dimension_numbers = #tpu.dot_dimension_numbers<[1], [0], [0], [1], [0, 0, 1, 1], [], []>} : vector<4x8xbf16>, vector<8x64xbf16>, vector<4x64xf32> -> vector<4x64xf32>
    %158 = arith.addf %154, %157 : vector<4x64xf32>
    %c12 = arith.constant 12 : index
    %c0_103 = arith.constant 0 : index
    %c0_104 = arith.constant 0 : index
    %159 = vector.load %arg4[%c12, %c0_103, %c0_104] : memref<18x4x8xbf16, #tpu.memory_space<vmem>>, vector<1x4x8xbf16>
    %160 = vector.shape_cast %159 : vector<1x4x8xbf16> to vector<4x8xbf16>
    %cst_105 = arith.constant dense<0.000000e+00> : vector<4x64xf32>
    %161 = tpu.matmul %160, %82, %cst_105 {dimension_numbers = #tpu.dot_dimension_numbers<[1], [0], [0], [1], [0, 0, 1, 1], [], []>} : vector<4x8xbf16>, vector<8x64xbf16>, vector<4x64xf32> -> vector<4x64xf32>
    %162 = arith.addf %158, %161 : vector<4x64xf32>
    %c13 = arith.constant 13 : index
    %c0_106 = arith.constant 0 : index
    %c0_107 = arith.constant 0 : index
    %163 = vector.load %arg4[%c13, %c0_106, %c0_107] : memref<18x4x8xbf16, #tpu.memory_space<vmem>>, vector<1x4x8xbf16>
    %164 = vector.shape_cast %163 : vector<1x4x8xbf16> to vector<4x8xbf16>
    %cst_108 = arith.constant dense<0.000000e+00> : vector<4x64xf32>
    %165 = tpu.matmul %164, %87, %cst_108 {dimension_numbers = #tpu.dot_dimension_numbers<[1], [0], [0], [1], [0, 0, 1, 1], [], []>} : vector<4x8xbf16>, vector<8x64xbf16>, vector<4x64xf32> -> vector<4x64xf32>
    %166 = arith.addf %162, %165 : vector<4x64xf32>
    %c14 = arith.constant 14 : index
    %c0_109 = arith.constant 0 : index
    %c0_110 = arith.constant 0 : index
    %167 = vector.load %arg4[%c14, %c0_109, %c0_110] : memref<18x4x8xbf16, #tpu.memory_space<vmem>>, vector<1x4x8xbf16>
    %168 = vector.shape_cast %167 : vector<1x4x8xbf16> to vector<4x8xbf16>
    %cst_111 = arith.constant dense<0.000000e+00> : vector<4x64xf32>
    %169 = tpu.matmul %168, %93, %cst_111 {dimension_numbers = #tpu.dot_dimension_numbers<[1], [0], [0], [1], [0, 0, 1, 1], [], []>} : vector<4x8xbf16>, vector<8x64xbf16>, vector<4x64xf32> -> vector<4x64xf32>
    %170 = arith.addf %166, %169 : vector<4x64xf32>
    %c15 = arith.constant 15 : index
    %c0_112 = arith.constant 0 : index
    %c0_113 = arith.constant 0 : index
    %171 = vector.load %arg4[%c15, %c0_112, %c0_113] : memref<18x4x8xbf16, #tpu.memory_space<vmem>>, vector<1x4x8xbf16>
    %172 = vector.shape_cast %171 : vector<1x4x8xbf16> to vector<4x8xbf16>
    %cst_114 = arith.constant dense<0.000000e+00> : vector<4x64xf32>
    %173 = tpu.matmul %172, %99, %cst_114 {dimension_numbers = #tpu.dot_dimension_numbers<[1], [0], [0], [1], [0, 0, 1, 1], [], []>} : vector<4x8xbf16>, vector<8x64xbf16>, vector<4x64xf32> -> vector<4x64xf32>
    %174 = arith.addf %170, %173 : vector<4x64xf32>
    %c16 = arith.constant 16 : index
    %c0_115 = arith.constant 0 : index
    %c0_116 = arith.constant 0 : index
    %175 = vector.load %arg4[%c16, %c0_115, %c0_116] : memref<18x4x8xbf16, #tpu.memory_space<vmem>>, vector<1x4x8xbf16>
    %176 = vector.shape_cast %175 : vector<1x4x8xbf16> to vector<4x8xbf16>
    %cst_117 = arith.constant dense<0.000000e+00> : vector<4x64xf32>
    %177 = tpu.matmul %176, %105, %cst_117 {dimension_numbers = #tpu.dot_dimension_numbers<[1], [0], [0], [1], [0, 0, 1, 1], [], []>} : vector<4x8xbf16>, vector<8x64xbf16>, vector<4x64xf32> -> vector<4x64xf32>
    %178 = arith.addf %174, %177 : vector<4x64xf32>
    %c17 = arith.constant 17 : index
    %c0_118 = arith.constant 0 : index
    %c0_119 = arith.constant 0 : index
    %179 = vector.load %arg4[%c17, %c0_118, %c0_119] : memref<18x4x8xbf16, #tpu.memory_space<vmem>>, vector<1x4x8xbf16>
    %180 = vector.shape_cast %179 : vector<1x4x8xbf16> to vector<4x8xbf16>
    %cst_120 = arith.constant dense<0.000000e+00> : vector<4x64xf32>
    %181 = tpu.matmul %180, %111, %cst_120 {dimension_numbers = #tpu.dot_dimension_numbers<[1], [0], [0], [1], [0, 0, 1, 1], [], []>} : vector<4x8xbf16>, vector<8x64xbf16>, vector<4x64xf32> -> vector<4x64xf32>
    %182 = arith.addf %178, %181 : vector<4x64xf32>
    %c0_121 = arith.constant 0 : index
    %c0_122 = arith.constant 0 : index
    %183 = vector.load %arg5[%c0_121, %c0_122] : memref<4x1xf32, #tpu.memory_space<vmem>>, vector<4x1xf32>
    %184 = vector.broadcast %183 : vector<4x1xf32> to vector<4x64xf32>
    %185 = arith.mulf %182, %184 : vector<4x64xf32>
    %c0_123 = arith.constant 0 : index
    %c0_124 = arith.constant 0 : index
    %186 = vector.load %arg6[%c0_123, %c0_124] : memref<4x1xf32, #tpu.memory_space<vmem>>, vector<4x1xf32>
    %187 = vector.broadcast %186 : vector<4x1xf32> to vector<4x64xf32>
    %188 = arith.addf %185, %187 : vector<4x64xf32>
    %cst_125 = arith.constant 0.000000e+00 : f32
    %189 = vector.broadcast %cst_125 : f32 to vector<4x64xf32>
    %190 = arith.maximumf %188, %189 : vector<4x64xf32>
    %c9_i32_126 = arith.constant 9 : i32
    %191 = tpu.dynamic_rotate %190 by %c9_i32_126 dim 1 : vector<4x64xf32>, i32 -> vector<4x64xf32>
    %c0_127 = arith.constant 0 : index
    %c0_128 = arith.constant 0 : index
    %c0_129 = arith.constant 0 : index
    %192 = vector.load %arg1[%c0_127, %c0_128, %c0_129] : memref<9x1x64xf32, #tpu.memory_space<vmem>>, vector<1x1x64xf32>
    %193 = vector.shape_cast %192 : vector<1x1x64xf32> to vector<1x64xf32>
    %194 = vector.broadcast %193 : vector<1x64xf32> to vector<4x64xf32>
    %195 = arith.mulf %191, %194 : vector<4x64xf32>
    %196 = arith.truncf %195 : vector<4x64xf32> to vector<4x64xbf16>
    %c8_i32_130 = arith.constant 8 : i32
    %197 = tpu.dynamic_rotate %190 by %c8_i32_130 dim 1 : vector<4x64xf32>, i32 -> vector<4x64xf32>
    %c1_131 = arith.constant 1 : index
    %c0_132 = arith.constant 0 : index
    %c0_133 = arith.constant 0 : index
    %198 = vector.load %arg1[%c1_131, %c0_132, %c0_133] : memref<9x1x64xf32, #tpu.memory_space<vmem>>, vector<1x1x64xf32>
    %199 = vector.shape_cast %198 : vector<1x1x64xf32> to vector<1x64xf32>
    %200 = vector.broadcast %199 : vector<1x64xf32> to vector<4x64xf32>
    %201 = arith.mulf %197, %200 : vector<4x64xf32>
    %202 = arith.truncf %201 : vector<4x64xf32> to vector<4x64xbf16>
    %c7_i32_134 = arith.constant 7 : i32
    %203 = tpu.dynamic_rotate %190 by %c7_i32_134 dim 1 : vector<4x64xf32>, i32 -> vector<4x64xf32>
    %c2_135 = arith.constant 2 : index
    %c0_136 = arith.constant 0 : index
    %c0_137 = arith.constant 0 : index
    %204 = vector.load %arg1[%c2_135, %c0_136, %c0_137] : memref<9x1x64xf32, #tpu.memory_space<vmem>>, vector<1x1x64xf32>
    %205 = vector.shape_cast %204 : vector<1x1x64xf32> to vector<1x64xf32>
    %206 = vector.broadcast %205 : vector<1x64xf32> to vector<4x64xf32>
    %207 = arith.mulf %203, %206 : vector<4x64xf32>
    %208 = arith.truncf %207 : vector<4x64xf32> to vector<4x64xbf16>
    %c1_i32_138 = arith.constant 1 : i32
    %209 = tpu.dynamic_rotate %190 by %c1_i32_138 dim 1 : vector<4x64xf32>, i32 -> vector<4x64xf32>
    %c3_139 = arith.constant 3 : index
    %c0_140 = arith.constant 0 : index
    %c0_141 = arith.constant 0 : index
    %210 = vector.load %arg1[%c3_139, %c0_140, %c0_141] : memref<9x1x64xf32, #tpu.memory_space<vmem>>, vector<1x1x64xf32>
    %211 = vector.shape_cast %210 : vector<1x1x64xf32> to vector<1x64xf32>
    %212 = vector.broadcast %211 : vector<1x64xf32> to vector<4x64xf32>
    %213 = arith.mulf %209, %212 : vector<4x64xf32>
    %214 = arith.truncf %213 : vector<4x64xf32> to vector<4x64xbf16>
    %c4_142 = arith.constant 4 : index
    %c0_143 = arith.constant 0 : index
    %c0_144 = arith.constant 0 : index
    %215 = vector.load %arg1[%c4_142, %c0_143, %c0_144] : memref<9x1x64xf32, #tpu.memory_space<vmem>>, vector<1x1x64xf32>
    %216 = vector.shape_cast %215 : vector<1x1x64xf32> to vector<1x64xf32>
    %217 = vector.broadcast %216 : vector<1x64xf32> to vector<4x64xf32>
    %218 = arith.mulf %190, %217 : vector<4x64xf32>
    %219 = arith.truncf %218 : vector<4x64xf32> to vector<4x64xbf16>
    %c63_i32_145 = arith.constant 63 : i32
    %220 = tpu.dynamic_rotate %190 by %c63_i32_145 dim 1 : vector<4x64xf32>, i32 -> vector<4x64xf32>
    %c5_146 = arith.constant 5 : index
    %c0_147 = arith.constant 0 : index
    %c0_148 = arith.constant 0 : index
    %221 = vector.load %arg1[%c5_146, %c0_147, %c0_148] : memref<9x1x64xf32, #tpu.memory_space<vmem>>, vector<1x1x64xf32>
    %222 = vector.shape_cast %221 : vector<1x1x64xf32> to vector<1x64xf32>
    %223 = vector.broadcast %222 : vector<1x64xf32> to vector<4x64xf32>
    %224 = arith.mulf %220, %223 : vector<4x64xf32>
    %225 = arith.truncf %224 : vector<4x64xf32> to vector<4x64xbf16>
    %c57_i32_149 = arith.constant 57 : i32
    %226 = tpu.dynamic_rotate %190 by %c57_i32_149 dim 1 : vector<4x64xf32>, i32 -> vector<4x64xf32>
    %c6_150 = arith.constant 6 : index
    %c0_151 = arith.constant 0 : index
    %c0_152 = arith.constant 0 : index
    %227 = vector.load %arg1[%c6_150, %c0_151, %c0_152] : memref<9x1x64xf32, #tpu.memory_space<vmem>>, vector<1x1x64xf32>
    %228 = vector.shape_cast %227 : vector<1x1x64xf32> to vector<1x64xf32>
    %229 = vector.broadcast %228 : vector<1x64xf32> to vector<4x64xf32>
    %230 = arith.mulf %226, %229 : vector<4x64xf32>
    %231 = arith.truncf %230 : vector<4x64xf32> to vector<4x64xbf16>
    %c56_i32_153 = arith.constant 56 : i32
    %232 = tpu.dynamic_rotate %190 by %c56_i32_153 dim 1 : vector<4x64xf32>, i32 -> vector<4x64xf32>
    %c7_154 = arith.constant 7 : index
    %c0_155 = arith.constant 0 : index
    %c0_156 = arith.constant 0 : index
    %233 = vector.load %arg1[%c7_154, %c0_155, %c0_156] : memref<9x1x64xf32, #tpu.memory_space<vmem>>, vector<1x1x64xf32>
    %234 = vector.shape_cast %233 : vector<1x1x64xf32> to vector<1x64xf32>
    %235 = vector.broadcast %234 : vector<1x64xf32> to vector<4x64xf32>
    %236 = arith.mulf %232, %235 : vector<4x64xf32>
    %237 = arith.truncf %236 : vector<4x64xf32> to vector<4x64xbf16>
    %c55_i32_157 = arith.constant 55 : i32
    %238 = tpu.dynamic_rotate %190 by %c55_i32_157 dim 1 : vector<4x64xf32>, i32 -> vector<4x64xf32>
    %c8_158 = arith.constant 8 : index
    %c0_159 = arith.constant 0 : index
    %c0_160 = arith.constant 0 : index
    %239 = vector.load %arg1[%c8_158, %c0_159, %c0_160] : memref<9x1x64xf32, #tpu.memory_space<vmem>>, vector<1x1x64xf32>
    %240 = vector.shape_cast %239 : vector<1x1x64xf32> to vector<1x64xf32>
    %241 = vector.broadcast %240 : vector<1x64xf32> to vector<4x64xf32>
    %242 = arith.mulf %238, %241 : vector<4x64xf32>
    %243 = arith.truncf %242 : vector<4x64xf32> to vector<4x64xbf16>
    %c0_161 = arith.constant 0 : index
    %c0_162 = arith.constant 0 : index
    %c0_163 = arith.constant 0 : index
    %244 = vector.load %arg7[%c0_161, %c0_162, %c0_163] : memref<9x4x4xbf16, #tpu.memory_space<vmem>>, vector<1x4x4xbf16>
    %245 = vector.shape_cast %244 : vector<1x4x4xbf16> to vector<4x4xbf16>
    %cst_164 = arith.constant dense<0.000000e+00> : vector<4x64xf32>
    %246 = tpu.matmul %245, %196, %cst_164 {dimension_numbers = #tpu.dot_dimension_numbers<[1], [0], [0], [1], [0, 0, 1, 1], [], []>} : vector<4x4xbf16>, vector<4x64xbf16>, vector<4x64xf32> -> vector<4x64xf32>
    %c1_165 = arith.constant 1 : index
    %c0_166 = arith.constant 0 : index
    %c0_167 = arith.constant 0 : index
    %247 = vector.load %arg7[%c1_165, %c0_166, %c0_167] : memref<9x4x4xbf16, #tpu.memory_space<vmem>>, vector<1x4x4xbf16>
    %248 = vector.shape_cast %247 : vector<1x4x4xbf16> to vector<4x4xbf16>
    %cst_168 = arith.constant dense<0.000000e+00> : vector<4x64xf32>
    %249 = tpu.matmul %248, %202, %cst_168 {dimension_numbers = #tpu.dot_dimension_numbers<[1], [0], [0], [1], [0, 0, 1, 1], [], []>} : vector<4x4xbf16>, vector<4x64xbf16>, vector<4x64xf32> -> vector<4x64xf32>
    %250 = arith.addf %246, %249 : vector<4x64xf32>
    %c2_169 = arith.constant 2 : index
    %c0_170 = arith.constant 0 : index
    %c0_171 = arith.constant 0 : index
    %251 = vector.load %arg7[%c2_169, %c0_170, %c0_171] : memref<9x4x4xbf16, #tpu.memory_space<vmem>>, vector<1x4x4xbf16>
    %252 = vector.shape_cast %251 : vector<1x4x4xbf16> to vector<4x4xbf16>
    %cst_172 = arith.constant dense<0.000000e+00> : vector<4x64xf32>
    %253 = tpu.matmul %252, %208, %cst_172 {dimension_numbers = #tpu.dot_dimension_numbers<[1], [0], [0], [1], [0, 0, 1, 1], [], []>} : vector<4x4xbf16>, vector<4x64xbf16>, vector<4x64xf32> -> vector<4x64xf32>
    %254 = arith.addf %250, %253 : vector<4x64xf32>
    %c3_173 = arith.constant 3 : index
    %c0_174 = arith.constant 0 : index
    %c0_175 = arith.constant 0 : index
    %255 = vector.load %arg7[%c3_173, %c0_174, %c0_175] : memref<9x4x4xbf16, #tpu.memory_space<vmem>>, vector<1x4x4xbf16>
    %256 = vector.shape_cast %255 : vector<1x4x4xbf16> to vector<4x4xbf16>
    %cst_176 = arith.constant dense<0.000000e+00> : vector<4x64xf32>
    %257 = tpu.matmul %256, %214, %cst_176 {dimension_numbers = #tpu.dot_dimension_numbers<[1], [0], [0], [1], [0, 0, 1, 1], [], []>} : vector<4x4xbf16>, vector<4x64xbf16>, vector<4x64xf32> -> vector<4x64xf32>
    %258 = arith.addf %254, %257 : vector<4x64xf32>
    %c4_177 = arith.constant 4 : index
    %c0_178 = arith.constant 0 : index
    %c0_179 = arith.constant 0 : index
    %259 = vector.load %arg7[%c4_177, %c0_178, %c0_179] : memref<9x4x4xbf16, #tpu.memory_space<vmem>>, vector<1x4x4xbf16>
    %260 = vector.shape_cast %259 : vector<1x4x4xbf16> to vector<4x4xbf16>
    %cst_180 = arith.constant dense<0.000000e+00> : vector<4x64xf32>
    %261 = tpu.matmul %260, %219, %cst_180 {dimension_numbers = #tpu.dot_dimension_numbers<[1], [0], [0], [1], [0, 0, 1, 1], [], []>} : vector<4x4xbf16>, vector<4x64xbf16>, vector<4x64xf32> -> vector<4x64xf32>
    %262 = arith.addf %258, %261 : vector<4x64xf32>
    %c5_181 = arith.constant 5 : index
    %c0_182 = arith.constant 0 : index
    %c0_183 = arith.constant 0 : index
    %263 = vector.load %arg7[%c5_181, %c0_182, %c0_183] : memref<9x4x4xbf16, #tpu.memory_space<vmem>>, vector<1x4x4xbf16>
    %264 = vector.shape_cast %263 : vector<1x4x4xbf16> to vector<4x4xbf16>
    %cst_184 = arith.constant dense<0.000000e+00> : vector<4x64xf32>
    %265 = tpu.matmul %264, %225, %cst_184 {dimension_numbers = #tpu.dot_dimension_numbers<[1], [0], [0], [1], [0, 0, 1, 1], [], []>} : vector<4x4xbf16>, vector<4x64xbf16>, vector<4x64xf32> -> vector<4x64xf32>
    %266 = arith.addf %262, %265 : vector<4x64xf32>
    %c6_185 = arith.constant 6 : index
    %c0_186 = arith.constant 0 : index
    %c0_187 = arith.constant 0 : index
    %267 = vector.load %arg7[%c6_185, %c0_186, %c0_187] : memref<9x4x4xbf16, #tpu.memory_space<vmem>>, vector<1x4x4xbf16>
    %268 = vector.shape_cast %267 : vector<1x4x4xbf16> to vector<4x4xbf16>
    %cst_188 = arith.constant dense<0.000000e+00> : vector<4x64xf32>
    %269 = tpu.matmul %268, %231, %cst_188 {dimension_numbers = #tpu.dot_dimension_numbers<[1], [0], [0], [1], [0, 0, 1, 1], [], []>} : vector<4x4xbf16>, vector<4x64xbf16>, vector<4x64xf32> -> vector<4x64xf32>
    %270 = arith.addf %266, %269 : vector<4x64xf32>
    %c7_189 = arith.constant 7 : index
    %c0_190 = arith.constant 0 : index
    %c0_191 = arith.constant 0 : index
    %271 = vector.load %arg7[%c7_189, %c0_190, %c0_191] : memref<9x4x4xbf16, #tpu.memory_space<vmem>>, vector<1x4x4xbf16>
    %272 = vector.shape_cast %271 : vector<1x4x4xbf16> to vector<4x4xbf16>
    %cst_192 = arith.constant dense<0.000000e+00> : vector<4x64xf32>
    %273 = tpu.matmul %272, %237, %cst_192 {dimension_numbers = #tpu.dot_dimension_numbers<[1], [0], [0], [1], [0, 0, 1, 1], [], []>} : vector<4x4xbf16>, vector<4x64xbf16>, vector<4x64xf32> -> vector<4x64xf32>
    %274 = arith.addf %270, %273 : vector<4x64xf32>
    %c8_193 = arith.constant 8 : index
    %c0_194 = arith.constant 0 : index
    %c0_195 = arith.constant 0 : index
    %275 = vector.load %arg7[%c8_193, %c0_194, %c0_195] : memref<9x4x4xbf16, #tpu.memory_space<vmem>>, vector<1x4x4xbf16>
    %276 = vector.shape_cast %275 : vector<1x4x4xbf16> to vector<4x4xbf16>
    %cst_196 = arith.constant dense<0.000000e+00> : vector<4x64xf32>
    %277 = tpu.matmul %276, %243, %cst_196 {dimension_numbers = #tpu.dot_dimension_numbers<[1], [0], [0], [1], [0, 0, 1, 1], [], []>} : vector<4x4xbf16>, vector<4x64xbf16>, vector<4x64xf32> -> vector<4x64xf32>
    %278 = arith.addf %274, %277 : vector<4x64xf32>
    %c0_197 = arith.constant 0 : index
    %c0_198 = arith.constant 0 : index
    %279 = vector.load %arg8[%c0_197, %c0_198] : memref<4x1xf32, #tpu.memory_space<vmem>>, vector<4x1xf32>
    %280 = vector.broadcast %279 : vector<4x1xf32> to vector<4x64xf32>
    %281 = arith.mulf %278, %280 : vector<4x64xf32>
    %c0_199 = arith.constant 0 : index
    %c0_200 = arith.constant 0 : index
    %282 = vector.load %arg9[%c0_199, %c0_200] : memref<4x1xf32, #tpu.memory_space<vmem>>, vector<4x1xf32>
    %283 = vector.broadcast %282 : vector<4x1xf32> to vector<4x64xf32>
    %284 = arith.addf %281, %283 : vector<4x64xf32>
    %cst_201 = arith.constant 0.000000e+00 : f32
    %285 = vector.broadcast %cst_201 : f32 to vector<4x64xf32>
    %286 = arith.maximumf %284, %285 : vector<4x64xf32>
    %c0_202 = arith.constant 0 : index
    %c0_203 = arith.constant 0 : index
    %c0_204 = arith.constant 0 : index
    %287 = vector.load %arg10[%c0_202, %c0_203, %c0_204] : memref<1x4x64xf32, #tpu.memory_space<vmem>>, vector<1x4x64xf32>
    %288 = vector.shape_cast %287 : vector<1x4x64xf32> to vector<4x64xf32>
    %289 = vector.shape_cast %286 : vector<4x64xf32> to vector<1x4x64xf32>
    tpu.vector_store %arg10[%c0_202, %c0_203, %c0_204], %289 {strides = array<i32>} : memref<1x4x64xf32, #tpu.memory_space<vmem>>, vector<1x4x64xf32>,
    return
  }
  func.func @transform_0(%arg0: i32) -> (i32, i32, i32) {
    %c0_i32 = arith.constant 0 : i32
    %c0_i32_0 = arith.constant 0 : i32
    %c0_i32_1 = arith.constant 0 : i32
    %c0_i32_2 = arith.constant 0 : i32
    return %c0_i32, %c0_i32_0, %c0_i32_1 : i32, i32, i32
  }
  func.func @transform_1(%arg0: i32) -> (i32, i32, i32) {
    %c0_i32 = arith.constant 0 : i32
    %c0_i32_0 = arith.constant 0 : i32
    %c0_i32_1 = arith.constant 0 : i32
    return %arg0, %c0_i32, %c0_i32_0 : i32, i32, i32
  }
  func.func @transform_2(%arg0: i32) -> (i32, i32, i32) {
    %c0_i32 = arith.constant 0 : i32
    %c0_i32_0 = arith.constant 0 : i32
    %c0_i32_1 = arith.constant 0 : i32
    return %arg0, %c0_i32, %c0_i32_0 : i32, i32, i32
  }
  func.func @transform_3(%arg0: i32) -> (i32, i32, i32) {
    %c0_i32 = arith.constant 0 : i32
    %c0_i32_0 = arith.constant 0 : i32
    %c0_i32_1 = arith.constant 0 : i32
    %c0_i32_2 = arith.constant 0 : i32
    return %c0_i32, %c0_i32_0, %c0_i32_1 : i32, i32, i32
  }
  func.func @transform_4(%arg0: i32) -> (i32, i32) {
    %c0_i32 = arith.constant 0 : i32
    %c0_i32_0 = arith.constant 0 : i32
    %c0_i32_1 = arith.constant 0 : i32
    return %c0_i32, %c0_i32_0 : i32, i32
  }
  func.func @transform_5(%arg0: i32) -> (i32, i32) {
    %c0_i32 = arith.constant 0 : i32
    %c0_i32_0 = arith.constant 0 : i32
    %c0_i32_1 = arith.constant 0 : i32
    return %c0_i32, %c0_i32_0 : i32, i32
  }
  func.func @transform_6(%arg0: i32) -> (i32, i32, i32) {
    %c0_i32 = arith.constant 0 : i32
    %c0_i32_0 = arith.constant 0 : i32
    %c0_i32_1 = arith.constant 0 : i32
    %c0_i32_2 = arith.constant 0 : i32
    return %c0_i32, %c0_i32_0, %c0_i32_1 : i32, i32, i32
  }
  func.func @transform_7(%arg0: i32) -> (i32, i32) {
    %c0_i32 = arith.constant 0 : i32
    %c0_i32_0 = arith.constant 0 : i32
    %c0_i32_1 = arith.constant 0 : i32
    return %c0_i32, %c0_i32_0 : i32, i32
  }
  func.func @transform_8(%arg0: i32) -> (i32, i32) {
    %c0_i32 = arith.constant 0 : i32
    %c0_i32_0 = arith.constant 0 : i32
    %c0_i32_1 = arith.constant 0 : i32
    return %c0_i32, %c0_i32_0 : i32, i32
  }
  func.func @transform_9(%arg0: i32) -> (i32, i32, i32) {
    %c0_i32 = arith.constant 0 : i32
    %c0_i32_0 = arith.constant 0 : i32
    %c0_i32_1 = arith.constant 0 : i32
    return %arg0, %c0_i32, %c0_i32_0 : i32, i32, i32
  }
}

</mosaic_0001>

<bundles_post_ra>
// kernel: tpu_custom_call.1
= control target key start
LH: loop header
LB: loop body
LE: loop exit
PB: predicated region body
PF: predicated region fallthrough
CT: control target
= control target key end

     0   :  { %s1534_s0 = inlined_call_operand.hbm [shape: f32[9,1,64], index: 0, kind: input, shape index: {}]   ;;  %s1535_s1 = inlined_call_operand.vmem [shape: bf16[2,8,64], index: 1, kind: input, shape index: {}]   ;;  %s1536_s2 = inlined_call_operand.hbm [shape: bf16[2,8,64], index: 2, kind: input, shape index: {}]   ;;  %s1537_s3 = inlined_call_operand.vmem [shape: bf16[4,144], index: 3, kind: input, shape index: {}]   ;;  %s1538_s4 = inlined_call_operand.vmem [shape: f32[4,1], index: 4, kind: input, shape index: {}]   ;;  %s1539_s5 = inlined_call_operand.vmem [shape: f32[4,1], index: 5, kind: input, shape index: {}]   ;;  %s1540_s6 = inlined_call_operand.vmem [shape: bf16[4,36], index: 6, kind: input, shape index: {}]   ;;  %s1541_s7 = inlined_call_operand.vmem [shape: f32[4,1], index: 7, kind: input, shape index: {}]   ;;  %s1542_s8 = inlined_call_operand.vmem [shape: f32[4,1], index: 8, kind: input, shape index: {}]   ;;  %s1543_s9 = inlined_call_operand.hbm [shape: f32[2,4,64], index: 9, kind: output, shape index: {}]  }
   0x1   :  { %1546 = sst [smem:[#allocation13_spill]] %s1534_s0 }
   0x2   :  { %14 = vsyncpa [#allocation3], 0 }
   0x3   :  { %15 = vsyncpa [#allocation6], 0 }
   0x4   :  { %17 = vsyncpa [#allocation6 + $0x1], 0 }
   0x5   :  { %18 = vsyncpa [#allocation4], 0 }
   0x6   :  { %20 = vsyncpa [#allocation4 + $0x1], 0  ;;  %s1243_s30 = smov 0   ;;  %s1245_s10 = smov 0  }
   0x7   :  { %s1247_s11 = smov 0   ;;  %s1249_s12 = smov 0  }
   0x8 LB: > { %1547 = sst [smem:[#allocation11_spill]] %s1166_s11  ;;  %s1267_s16 = sadd.s32 4294967295, %s1170_s12   ;;  %s1170_s12 = sphi %s1249_s12, %s1561_s12   ;;  %s1166_s11 = sphi %s1247_s11, %s1558_s11   ;;  %s1162_s10 = sphi %s1245_s10, %s1560_s10   ;;  %s1158_s30 = sphi %s1243_s30, %s1559_s30  }
   0x9   : > { %s1548_s0 = sld [smem:[#allocation13_spill]]  ;;  %p935_p0 = scmp.ge.s32.totalorder %s1170_s12, 1 }
   0xa   : > { %p94_p1 = scmp.eq.s32.totalorder %s1267_s16, 0  ;;  %p256_p2 = scmp.lt.s32.totalorder %s1170_s12, 3 }
   0xb   : > { %s1172_s18 = smov [#allocation2]   ;;  %s1173_s20 = smov 16  }
   0xc   : > { %p1272_p3 = pnand %p935_p0, %p256_p2  ;;  %s269_s19 = sshll.u32 %s1172_s18, 4  ;;  %s270_s19 = int_to_ptr.vmem [resolvable:$true] %s269_s19 }
   0xd   : > { %s1174_s21 = smov 1   ;;  %s934_s22 = sadd.s32 4294967294, %s1170_s12  }
   0xe   : > { %p959_p4 = pneg %p1272_p3  ;;  %s1283_s23 = sadd.s32 1, %s1170_s12  }
   0xf   : > { %s267_s15 = sshll.u32 %s1548_s0, 4  ;;  %s80_s24 = sadd.s32 1, %s1166_s11  ;;  %s268_s15 = int_to_ptr.hbm [resolvable:$true] %s267_s15 }
  0x10   : > { %p960_p6 = pnand %p959_p4, %p94_p1  ;;  %s77_s25 = ssub.s32 %s1170_s12, %s1283_s23 }
  0x11   : > { %p87_p7 = scmp.ne.s32.totalorder %s1166_s11, %s1162_s10  ;;  %p78_p8 = scmp.eq.s32.totalorder %s77_s25, 0 }
  0x12   : > { %962 = dma.hbm_to_vmem [thread:$0]  (!%p960_p6), %s268_s15, 144, %s270_s19, [#allocation3], %s1173_s20, %s1173_s20, %s1174_s21  }
  0x13   : > { %p88_p9 = scmp.eq.s32.totalorder %s1170_s12, 0  ;;  %p93_p10 = scmp.ne.s32.totalorder %s1162_s10, %s1158_s30 }
  0x14   : > { %p243_p11 = scmp.eq.s32.totalorder %s1267_s16, 1  ;;  %p249_p0 = scmp.eq.s32.totalorder %s934_s22, 1 }
  0x15   : > { %s1295_s26 = scalar_select %p78_p8, %s1166_s11, %s80_s24  }
  0x16   : > { %p1299_p12 = por %p94_p1, %p93_p10  ;;  %p1303_p13 = por %p243_p11, %p87_p7 }
  0x17   : > { %1550 = sst [smem:[#allocation12_spill]] %s1295_s26  ;;  %p89_p2 = por %p88_p9, %p87_p7 }
  0x18   : > { %s308_s29 = sand.u32 1, %s1166_s11   ;;  %p1308_p4 = por %p249_p0, %p93_p10 }
  0x19   : > { %p972_p6 = scmp.lt.s32.totalorder %s1170_s12, 2  ;;  %s938_s14 = sshll.u32 %s308_s29, 2 }
  0x1a   : > { %s939_s15 = sshll.u32 %s1170_s12, 2  ;;  %s312_s24 = scalar_lea.vmem [#allocation5], %s938_s14 }
  0x1b   : > { %s316_s20 = scalar_lea.hbm %s1536_s2, %s939_s15  ;;  %s320_s25 = sshll.u32 %s312_s24, 4  ;;  %s321_s25 = int_to_ptr.vmem [resolvable:$true] %s320_s25 }
  0x1c   : > { %s318_s21 = sshll.u32 %s316_s20, 4  ;;  %p1317_p8 = pnand %p972_p6, %p89_p2  ;;  %s319_s21 = int_to_ptr.hbm [resolvable:$true] %s318_s21 }
  0x1d   : > { %s309_s0 = scalar_lea.sflag [#allocation6], %s308_s29  ;;  %s1070_s26 = sshra.s32 %s319_s21, 4  ;;  %s1071_s26 = int_to_ptr.hbm [resolvable:$true] %s1070_s26 }
  0x1e   : > { %s1072_s11 = scalar_lea.hbm %s1071_s26, 4  ;;  %p1074_p9 = pneg %p1317_p8 }
  0x1f   : > { %p1073_p7 = scmp.ne.s32.totalorder %s1071_s26, %s1072_s11  ;;  %s1077_s14 = scalar_lea.hbm %s1536_s2, 8 }
  0x20   : > { %p1078_p0 = scmp.lt.s32.totalorder %s1071_s26, %s1536_s2  ;;  %p1079_p2 = scmp.lt.s32.totalorder %s1077_s14, %s1072_s11 }
  0x21   : > { %p1075_p10 = pnand %p1074_p9, %p1073_p7 }
  0x22   : > { %p1080_p6 = por %p1079_p2, %p1078_p0 }
  0x23   : > { %p1076_p11 = pneg %p1075_p10 }
  0x25   : > { %p1081_p5 = pnand %p1080_p6, %p1076_p11 }
  0x27   : > { %1084 = shalt.err (!%p1081_p5)
}
  0x28   : > { %966 = dma.hbm_to_vmem [thread:$0]  (!%p1317_p8), %s319_s21, 64, %s321_s25, %s309_s0  }
  0x29   : > { %329 = sbr.rel (%p1272_p3) target bundleno = 1388 (0x56c), region = 56 }
  0x2e   : > { %1145 = dma.done.wait (%p94_p1), [#allocation3], 144  }
  0x2f   : > { %1147 = vsyncadd (%p94_p1), [#allocation3], 4294967152  ;;  %s1338_s29 = sand.u32 1, %s1162_s10  }
  0x30   : > { %s1545_s11 = sshll.u32 %s1338_s29, 2  ;;  %s337_s26 = scalar_lea.sflag [#allocation6], %s1338_s29 }
  0x31   : > { %s340_s0 = scalar_lea.vmem [#allocation5], %s1545_s11 }
  0x32   : > { %1149 = dma.done.wait (%p1299_p12), %s337_s26, 64  }
  0x33   : > { %1151 = vsyncadd (%p1299_p12), %s337_s26, 4294967232  ;;  %p380_p3 = scmp.lt.s32.totalorder %s1267_s16, 1  ;;  %v472_v0 = vld [vmem:[%s340_s0] sm:$0xf]  ;;  %s1175_s15 = smov 64   ;;  %vm387_vm0 = vcmask 1048064  }
  0x34   : > { %v473_v1 = vunpack.c.l.bf16 %v472_v0  ;;  %v1031_v4 = vld [vmem:[#allocation2 + $0x3] ss:$0 sm:$0xff]  ;;  %s1176_s27 = smov 63   ;;  %v1033_v5 = vld [vmem:[#allocation2 + $0x5] ss:$0 sm:$0xff]  ;;  %s1177_s18 = smov 1  }
  0x35   : > { %s381_s17 = scalar_select %p380_p3, %s1267_s16, 1  ;;  %440 = vrot.lane.b32.xlu2 %v1033_v5, %s1177_s18  ;;  %v1035_v6 = vld [vmem:[#allocation2 + $0x6] ss:$0 sm:$0xff]  ;;  %v1037_v7 = vld [vmem:[#allocation2 + $0x2] ss:$0 sm:$0xff]  ;;  %vm571_vm1 = vcmask 1043456  }
  0x36   : > { %474 = vrot.lane.b32.xlu0 %v473_v1, %s1175_s15  ;;  %s1178_s14 = smov 7   ;;  %s1179_s19 = smov 57   ;;  %v1032_v10 = vld [vmem:[#allocation2 + $0x8] ss:$0 sm:$0xff]  ;;  %v1034_v13 = vld [vmem:[#allocation2 + $0x1] ss:$0 sm:$0xff] }
  0x37   : > { %s944_s21 = sshll.u32 %s381_s17, 2  ;;  %s1180_s20 = smov 9   ;;  %v1036_v14 = vld [vmem:[#allocation2 + $0x7] ss:$0 sm:$0xff]  ;;  %v1359_v15 = vld [vmem:[#allocation2 + $0x4] ss:$0 sm:$0xff] }
  0x38   : > { %s383_s22 = scalar_lea.vmem %s1535_s1, %s944_s21  ;;  %s1181_s26 = smov 56   ;;  %v488_v16 = vmul.f32 %v1359_v15, %v473_v1  ;;  %v1039_v58 = vld [vmem:[#allocation2] ss:$0 sm:$0xff]  ;;  %vm648_vm2 = vcmask 130048   ;;  %vm760_vm3 = vcmask 1041408   ;;  %vm766_vm4 = vcmask 1045504  }
  0x39   : > { %v385_v2 = vld [vmem:[%s383_s22] sm:$0xf]  ;;  %s1182_s0 = smov 8   ;;  %s1183_s17 = smov 55   ;;  %vm787_vm5 = vcmask 293888   ;;  %vm822_vm6 = vcmask 519168  }
  0x3a   : > { %v386_v3 = vunpack.c.l.bf16 %v385_v2  ;;  %v489_v17 = vpack.c.bf16 %v488_v16, %v488_v16  ;;  %s1184_s21 = smov 48   ;;  %s1185_s24 = smov 54  }
  0x3b   : > { %s1186_s25 = smov 127   ;;  %s1187_s22 = smov 120  }
  0x3c   : > { %v557_v18 = vunpack.c.l.b16 %v489_v17  ;;  %v434_v41 = vmul.f32 %v1359_v15, %v386_v3  ;;  %s1189_s18 = smov 126  }
  0x3d   : > { %449 = vrot.lane.b32.xlu2 %v1035_v6, %s1178_s14  ;;  %s1190_s14 = smov 47  }
  0x3e   : > { %388 = vrot.lane.b32.xlu0 %v386_v3, %s1175_s15  ;;  %v558_v19 = vpack.c.b16 %v557_v18, %v557_v18  ;;  %v435_v48 = vpack.c.bf16 %v434_v41, %v434_v41 }
  0x40   : > { %v514_v54 = vunpack.c.l.b16 %v435_v48 }
  0x42   : > { %v515_v59 = vpack.c.b16 %v514_v54, %v514_v54 }
  0x45   : > { %415 = vrot.lane.b32.xlu2 %v1037_v7, %s1179_s19  ;;  %s1191_s19 = smov 73  }
  0x46   : > { %424 = vrot.lane.b32.xlu0 %v1031_v4, %s1176_s27  ;;  %s1188_s27 = smov 46  }
  0x8f   : > { %v1363_v20 = vpop.permute.xlu2 %440 }
  0x97   : > { %v1367_v22 = vpop.permute.xlu2 %449 }
  0x9f   : > { %v1380_v37 = vpop.permute.xlu2 %415 }
  0xa8   : > { %v475_v8 = vpop.permute.xlu0 %474 }
  0xa9   : > { %v476_v9 = vsel %vm387_vm0, %v475_v8, %v473_v1 }
  0xaa   : > { %477 = vrot.lane.b32.xlu1 %v476_v9, %s1175_s15 }
  0xb0   : > { %v389_v11 = vpop.permute.xlu0 %388 }
  0xb1   : > { %v390_v12 = vsel %vm387_vm0, %v389_v11, %v386_v3 }
  0xb2   : > { %467 = vrot.lane.b32.xlu1 %v1032_v10, %s1180_s20  ;;  %391 = vrot.lane.b32.xlu0 %v390_v12, %s1175_s15 }
  0xb8   : > { %v1365_v21 = vpop.permute.xlu0 %424 }
  0xba   : > { %406 = vrot.lane.b32.xlu1 %v1034_v13, %s1181_s26 }
  0xc2   : > { %458 = vrot.lane.b32.xlu1 %v1036_v14, %s1182_s0 }
  0xca   : > { %559 = vrot.lane.b32.xlu1 %v558_v19, %s1183_s17 }
 0x11c   : > { %v478_v23 = vpop.permute.xlu1 %477 }
 0x11d   : > { %v1370_v24 = vsel %vm387_vm0, %v478_v23, %v473_v1 }
 0x11e   : > { %v492_v25 = vmul.f32 %v1370_v24, %v1367_v22  ;;  %v490_v26 = vmul.f32 %v1370_v24, %v1363_v20  ;;  %v486_v27 = vmul.f32 %v1370_v24, %v1365_v21  ;;  %v484_v43 = vmul.f32 %v1370_v24, %v1380_v37 }
 0x120   : > { %v493_v28 = vpack.c.bf16 %v492_v25, %v492_v25  ;;  %v491_v29 = vpack.c.bf16 %v490_v26, %v490_v26  ;;  %v487_v32 = vpack.c.bf16 %v486_v27, %v486_v27  ;;  %v485_v50 = vpack.c.bf16 %v484_v43, %v484_v43 }
 0x122   : > { %v567_v30 = vunpack.c.l.b16 %v493_v28  ;;  %v562_v31 = vunpack.c.l.b16 %v491_v29  ;;  %v552_v44 = vunpack.c.l.b16 %v487_v32  ;;  %v547_v57 = vunpack.c.l.b16 %v485_v50 }
 0x124   : > { %v1378_v33 = vpop.permute.xlu1 %467  ;;  %v392_v34 = vpop.permute.xlu0 %391  ;;  %v568_v35 = vpack.c.b16 %v567_v30, %v567_v30  ;;  %v563_v36 = vpack.c.b16 %v562_v31, %v562_v31  ;;  %v553_v52 = vpack.c.b16 %v552_v44, %v552_v44  ;;  %v548_v63 = vpack.c.b16 %v547_v57, %v547_v57 }
 0x125   : > { %v496_v38 = vmul.f32 %v1370_v24, %v1378_v33  ;;  %v1385_v39 = vsel %vm387_vm0, %v392_v34, %v386_v3 }
 0x126   : > { %569 = vrot.lane.b32.xlu1 %v568_v35, %s1184_s21  ;;  %564 = vrot.lane.b32.xlu0 %v563_v36, %s1185_s24  ;;  %v470_v40 = vmul.f32 %v1378_v33, %v1385_v39  ;;  %v427_v55 = vmul.f32 %v1365_v21, %v1385_v39  ;;  %v452_v1 = vmul.f32 %v1367_v22, %v1385_v39 }
 0x127   : > { %v497_v42 = vpack.c.bf16 %v496_v38, %v496_v38  ;;  %v418_v2 = vmul.f32 %v1380_v37, %v1385_v39  ;;  %v443_v13 = vmul.f32 %v1363_v20, %v1385_v39 }
 0x128   : > { %v471_v45 = vpack.c.bf16 %v470_v40, %v470_v40  ;;  %v428_v60 = vpack.c.bf16 %v427_v55, %v427_v55  ;;  %v453_v7 = vpack.c.bf16 %v452_v1, %v452_v1 }
 0x129   : > { %v597_v46 = vunpack.c.l.b16 %v497_v42  ;;  %v419_v8 = vpack.c.bf16 %v418_v2, %v418_v2  ;;  %v444_v17 = vpack.c.bf16 %v443_v13, %v443_v13  ;;  %v684_v13 = vld [vmem:[%s1539_s5] sm:$0xf] }
 0x12a   : > { %v534_v47 = vunpack.c.l.b16 %v471_v45  ;;  %v509_v3 = vunpack.c.l.b16 %v428_v60  ;;  %v524_v12 = vunpack.c.l.b16 %v453_v7 }
 0x12b   : > { %v598_v49 = vpack.c.b16 %v597_v46, %v597_v46  ;;  %v504_v14 = vunpack.c.l.b16 %v419_v8  ;;  %v519_v23 = vunpack.c.l.b16 %v444_v17 }
 0x12c   : > { %v1394_v51 = vpop.permute.xlu1 %406  ;;  %v535_v53 = vpack.c.b16 %v534_v47, %v534_v47  ;;  %v510_v9 = vpack.c.b16 %v509_v3, %v509_v3  ;;  %v525_v16 = vpack.c.b16 %v524_v12, %v524_v12  ;;  %v677_v12 = vld [vmem:[%s1538_s4] sm:$0xf] }
 0x12d   : > { %599 = vrot.lane.b32.xlu2 %v598_v49, %s1186_s25  ;;  %v482_v56 = vmul.f32 %v1370_v24, %v1394_v51  ;;  %v505_v18 = vpack.c.b16 %v504_v14, %v504_v14  ;;  %v409_v19 = vmul.f32 %v1394_v51, %v1385_v39  ;;  %v520_v26 = vpack.c.b16 %v519_v23, %v519_v23 }
 0x12e   : > { %554 = vrot.lane.b32.xlu0 %v553_v52, %s1187_s22  ;;  %536 = vrot.lane.b32.xlu1 %v535_v53, %s1188_s27  ;;  %v1192_v14 = vmov 0  }
 0x12f   : > { %v483_v61 = vpack.c.bf16 %v482_v56, %v482_v56  ;;  %v410_v25 = vpack.c.bf16 %v409_v19, %v409_v19  ;;  %1028 = vset.pattern.permute.xlu1 %v1192_v14  ;;  %1029 = vset.pattern.permute.xlu2 %v1192_v14 }
 0x130   : > { %1030 = vset.pattern.permute.xlu0 %v1192_v14 }
 0x131   : > { %v542_v5 = vunpack.c.l.b16 %v483_v61  ;;  %v499_v27 = vunpack.c.l.b16 %v410_v25 }
 0x133   : > { %v543_v10 = vpack.c.b16 %v542_v5, %v542_v5  ;;  %v500_v28 = vpack.c.b16 %v499_v27, %v499_v27 }
 0x134   : > { %v1403_v62 = vpop.permute.xlu1 %458 }
 0x135   : > { %v461_v0 = vmul.f32 %v1403_v62, %v1385_v39  ;;  %397 = vrot.lane.b32.xlu2 %v1039_v58, %s1183_s17  ;;  %v494_v29 = vmul.f32 %v1370_v24, %v1403_v62 }
 0x136   : > { %549 = vrot.lane.b32.xlu0 %v548_v63, %s1189_s18  ;;  %516 = vrot.lane.b32.xlu1 %v515_v59, %s1183_s17 }
 0x137   : > { %v462_v4 = vpack.c.bf16 %v461_v0, %v461_v0  ;;  %v495_v30 = vpack.c.bf16 %v494_v29, %v494_v29 }
 0x139   : > { %v529_v6 = vunpack.c.l.b16 %v462_v4 }
 0x13b   : > { %v530_v11 = vpack.c.b16 %v529_v6, %v529_v6 }
 0x13c   : > { %v560_v34 = vpop.permute.xlu1 %559 }
 0x13d   : > { %544 = vrot.lane.b32.xlu2 %v543_v10, %s1186_s25 }
 0x13e   : > { %531 = vrot.lane.b32.xlu0 %v530_v11, %s1190_s14  ;;  %511 = vrot.lane.b32.xlu1 %v510_v9, %s1187_s22 }
 0x145   : > { %526 = vrot.lane.b32.xlu2 %v525_v16, %s1184_s21 }
 0x146   : > { %506 = vrot.lane.b32.xlu0 %v505_v18, %s1189_s18 }
 0x14d   : > { %521 = vrot.lane.b32.xlu2 %v520_v26, %s1185_s24 }
 0x155   : > { %501 = vrot.lane.b32.xlu2 %v500_v28, %s1186_s25 }
 0x187   : > { %v600_v31 = vpop.permute.xlu2 %599 }
 0x188   : > { %v603_v32 = vsel %vm571_vm1, %v495_v30, %v600_v31 }
 0x189   : > { %605 = vrot.lane.b32.xlu0 %v603_v32, %s1190_s14 }
 0x18f   : > { %v1429_v35 = vpop.permute.xlu2 %397 }
 0x190   : > { %v480_v36 = vmul.f32 %v1370_v24, %v1429_v35  ;;  %v400_v58 = vmul.f32 %v1429_v35, %v1385_v39  ;;  %v607_v39 = vld [vmem:[%s1537_s3] sm:$0xf] }
 0x191   : > { %609 = vst [vmem:[#allocation1] ss:$4 sm:$0xff] %v607_v39 }
 0x192   : > { %v481_v38 = vpack.c.bf16 %v480_v36, %v480_v36  ;;  %v401_v61 = vpack.c.bf16 %v400_v58, %v400_v58 }
 0x194   : > { %v539_v44 = vunpack.c.l.b16 %v481_v38 }
 0x196   : > { %v540_v45 = vpack.c.b16 %v539_v44, %v539_v44 }
 0x197   : > { %v545_v40 = vpop.permute.xlu2 %544 }
 0x198   : > { %v570_v41 = vpop.permute.xlu1 %569  ;;  %v565_v42 = vpop.permute.xlu0 %564  ;;  %v610_v11 = vld.sshfl [vmem:[#allocation1] sm:$0xff pattern:$0x73625140]  ;;  %v611_v17 = vld.sshfl [vmem:[#allocation1 + $0x8] sm:$0xff pattern:$0x73625140] }
 0x199   : > { %v595_v43 = vsel %vm571_vm1, %v565_v42, %v570_v41 }
 0x19a   : > { %635 = vrot.lane.b32.xlu1 %v595_v43, %s1191_s19 }
 0x19f   : > { %v527_v50 = vpop.permute.xlu2 %526 }
 0x1a0   : > { %v537_v46 = vpop.permute.xlu1 %536  ;;  %v555_v47 = vpop.permute.xlu0 %554 }
 0x1a1   : > { %v592_v48 = vsel %vm571_vm1, %v555_v47, %v560_v34  ;;  %v586_v49 = vsel %vm571_vm1, %v537_v46, %v540_v45 }
 0x1a2   : > { %633 = vrot.lane.b32.xlu2 %v592_v48, %s1191_s19  ;;  %629 = vrot.lane.b32.xlu1 %v586_v49, %s1191_s19 }
 0x1a7   : > { %v522_v53 = vpop.permute.xlu2 %521 }
 0x1a8   : > { %v550_v24 = vpop.permute.xlu0 %549  ;;  %v517_v54 = vpop.permute.xlu1 %516 }
 0x1a9   : > { %v589_v52 = vsel %vm571_vm1, %v545_v40, %v550_v24  ;;  %v580_v55 = vsel %vm571_vm1, %v517_v54, %v522_v53 }
 0x1aa   : > { %631 = vrot.lane.b32.xlu0 %v589_v52, %s1191_s19 }
 0x1af   : > { %v502_v59 = vpop.permute.xlu2 %501 }
 0x1b0   : > { %v532_v56 = vpop.permute.xlu0 %531  ;;  %v512_v60 = vpop.permute.xlu1 %511  ;;  %v574_v0 = vsel %vm571_vm1, %v401_v61, %v502_v59 }
 0x1b1   : > { %v583_v57 = vsel %vm571_vm1, %v527_v50, %v532_v56 }
 0x1b2   : > { %627 = vrot.lane.b32.xlu2 %v583_v57, %s1191_s19  ;;  %625 = vrot.lane.b32.xlu0 %v580_v55, %s1191_s19 }
 0x1b8   : > { %v507_v63 = vpop.permute.xlu0 %506 }
 0x1b9   : > { %v577_v1 = vsel %vm571_vm1, %v507_v63, %v512_v60 }
 0x1ba   : > { %621 = vrot.lane.b32.xlu2 %v574_v0, %s1191_s19  ;;  %623 = vrot.lane.b32.xlu1 %v577_v1, %s1191_s19 }
 0x1c2   : > { %680 = vperm.xlu1 %1028, %v677_v12   ;;  %687 = vperm.xlu2 %1029, %v684_v13  }
 0x1fb   : > { %v606_v2 = vpop.permute.xlu0 %605 }
 0x1fc   : > { %637 = vrot.lane.b32.xlu0 %v606_v2, %s1191_s19  ;;  %v634_v4 = vpop.permute.xlu2 %633 }
 0x20c   : > { %v636_v3 = vpop.permute.xlu1 %635  ;;  %v628_v7 = vpop.permute.xlu2 %627 }
 0x20d   : > { %651 = vmatpush.bf16.msra.mxu0 %v636_v3 }
 0x211   : > { %652 = vmatpush.bf16.msra.mxu0 %v634_v4 }
 0x214   : > { %v630_v6 = vpop.permute.xlu1 %629  ;;  %v622_v10 = vpop.permute.xlu2 %621 }
 0x21c   : > { %v632_v5 = vpop.permute.xlu0 %631  ;;  %v688_v27 = vpop.permute.xlu2 %687 }
 0x21d   : > { %653 = vmatpush.bf16.msra.mxu0 %v632_v5 }
 0x221   : > { %654 = vmatpush.bf16.msra.mxu0 %v630_v6 }
 0x224   : > { %v626_v8 = vpop.permute.xlu0 %625 }
 0x225   : > { %655 = vmatpush.bf16.msra.mxu0 %v628_v7 }
 0x229   : > { %656 = vmatpush.bf16.msra.mxu0 %v626_v8 }
 0x22c   : > { %v624_v9 = vpop.permute.xlu1 %623 }
 0x22d   : > { %657 = vmatpush.bf16.msra.mxu0 %v624_v9 }
 0x231   : > { %658 = vmatpush.bf16.msra.mxu0 %v622_v10 }
 0x234   : > { %659 = vmatmul.bf16.vlgmr.msra.gmra.mxu0 %v610_v11  ;;  %v681_v25 = vpop.permute.xlu1 %680 }
 0x26e   : > { %v638_v16 = vpop.permute.xlu0 %637 }
 0x26f   : > { %671 = vmatpush.bf16.msra.mxu1 %v638_v16 }
 0x272   : > { %945 = vmatmul.msk.bf16.vlgmr.msra.gmra.mxu1 %vm648_vm2, %v611_v17 }
 0x2b1   : > { %v660_v18 = vpop.f32.mrf.mxu0 }
 0x2b9   : > { %v662_v19 = vpop.f32.mrf.mxu0 }
 0x2ba   : > { %v814_v19 = vld [vmem:[%s1542_s8] sm:$0xf] }
 0x2ef   : > { %v673_v23 = vpop.f32.mrf.mxu1 }
 0x2f0   : > { %v674_v26 = vadd.f32 %v673_v23, %v660_v18 }
 0x2f2   : > { %v683_v28 = vmul.f32 %v681_v25, %v674_v26 }
 0x2f4   : > { %v690_v29 = vadd.f32 %v688_v27, %v683_v28 }
 0x2f6   : > { %v691_v30 = vmax.f32 %v690_v29, 0.0 }
 0x2f7   : > { %v675_v31 = vpop.f32.mrf.mxu1 }
 0x2f8   : > { %692 = vrot.lane.b32.xlu0 %v691_v30, %s1175_s15  ;;  %v706_v32 = vmul.f32 %v1359_v15, %v691_v30 }
 0x2fa   : > { %v707_v34 = vpack.c.bf16 %v706_v32, %v706_v32 }
 0x2fc   : > { %v734_v36 = vunpack.c.l.b16 %v707_v34 }
 0x2fe   : > { %v735_v38 = vpack.c.b16 %v734_v36, %v734_v36 }
 0x300   : > { %736 = vrot.lane.b32.xlu0 %v735_v38, %s1183_s17 }
 0x36a   : > { %v693_v40 = vpop.permute.xlu0 %692 }
 0x36b   : > { %v694_v41 = vsel %vm387_vm0, %v693_v40, %v691_v30 }
 0x36c   : > { %695 = vrot.lane.b32.xlu1 %v694_v41, %s1175_s15 }
 0x372   : > { %v737_v6 = vpop.permute.xlu0 %736 }
 0x3de   : > { %v696_v42 = vpop.permute.xlu1 %695 }
 0x3df   : > { %v697_v43 = vsel %vm387_vm0, %v696_v42, %v691_v30  ;;  %v776_v30 = vld [vmem:[%s1540_s6] sm:$0x3] }
 0x3e0   : > { %v714_v44 = vmul.f32 %v697_v43, %v1378_v33  ;;  %v708_v45 = vmul.f32 %v697_v43, %v1363_v20  ;;  %v712_v46 = vmul.f32 %v697_v43, %v1403_v62  ;;  %v700_v15 = vmul.f32 %v697_v43, %v1394_v51 }
 0x3e1   : > { %v704_v47 = vmul.f32 %v697_v43, %v1365_v21  ;;  %v710_v24 = vmul.f32 %v697_v43, %v1367_v22  ;;  %v702_v60 = vmul.f32 %v697_v43, %v1380_v37  ;;  %v807_v37 = vld [vmem:[%s1541_s7] sm:$0xf]  ;;  %v698_v13 = vmul.f32 %v697_v43, %v1429_v35 }
 0x3e2   : > { %v715_v48 = vpack.c.bf16 %v714_v44, %v714_v44  ;;  %v709_v49 = vpack.c.bf16 %v708_v45, %v708_v45  ;;  %v713_v50 = vpack.c.bf16 %v712_v46, %v712_v46  ;;  %v701_v52 = vpack.c.bf16 %v700_v15, %v700_v15 }
 0x3e3   : > { %v705_v56 = vpack.c.bf16 %v704_v47, %v704_v47  ;;  %v711_v20 = vpack.c.bf16 %v710_v24, %v710_v24  ;;  %v703_v1 = vpack.c.bf16 %v702_v60, %v702_v60  ;;  %v699_v14 = vpack.c.bf16 %v698_v13, %v698_v13 }
 0x3e4   : > { %v756_v53 = vunpack.c.l.b16 %v715_v48  ;;  %v739_v54 = vunpack.c.l.b16 %v709_v49  ;;  %v750_v55 = vunpack.c.l.b16 %v713_v50  ;;  %v717_v59 = vunpack.c.l.b16 %v701_v52 }
 0x3e5   : > { %v728_v21 = vunpack.c.l.b16 %v705_v56  ;;  %v745_v22 = vunpack.c.l.b16 %v711_v20  ;;  %v723_v4 = vunpack.c.l.b16 %v703_v1 }
 0x3e6   : > { %v757_v57 = vpack.c.b16 %v756_v53, %v756_v53  ;;  %v740_v33 = vpack.c.b16 %v739_v54, %v739_v54  ;;  %v751_v58 = vpack.c.b16 %v750_v55, %v750_v55  ;;  %v718_v61 = vpack.c.b16 %v717_v59, %v717_v59 }
 0x3e7   : > { %v729_v63 = vpack.c.b16 %v728_v21, %v728_v21  ;;  %v746_v0 = vpack.c.b16 %v745_v22, %v745_v22  ;;  %v724_v39 = vpack.c.b16 %v723_v4, %v723_v4 }
 0x3e8   : > { %758 = vrot.lane.b32.xlu2 %v757_v57, %s1188_s27  ;;  %v741_v62 = vrot.slane %v740_v33, 6  ;;  %v752_v51 = vrot.slane %v751_v58, 2  ;;  %v719_v2 = vrot.slane %v718_v61, 6 }
 0x3e9   : > { %v730_v3 = vrot.slane %v729_v63, 2 }
 0x3ea   : > { %742 = vrot.lane.b32.xlu1 %v741_v62, %s1185_s24  ;;  %753 = vrot.lane.b32.xlu0 %v752_v51, %s1190_s14  ;;  %s1120_s24 = scalar_lea.hbm %s1543_s9, 8 }
 0x3f0   : > { %747 = vrot.lane.b32.xlu2 %v746_v0, %s1184_s21 }
 0x3f2   : > { %720 = vrot.lane.b32.xlu1 %v719_v2, %s1186_s25  ;;  %731 = vrot.lane.b32.xlu0 %v730_v3, %s1187_s22  ;;  %s948_s22 = sshll.u32 %s1267_s16, 2  ;;  %s825_s16 = scalar_lea.sflag [#allocation4], %s1338_s29 }
 0x3f3   : > { %s835_s14 = scalar_lea.hbm %s1543_s9, %s948_s22 }
 0x3f4   : > { %s839_s26 = sshll.u32 %s835_s14, 4  ;;  %s840_s26 = int_to_ptr.hbm [resolvable:$true] %s839_s26 }
 0x3f5   : > { %s1114_s11 = sshra.s32 %s840_s26, 4  ;;  %s1115_s11 = int_to_ptr.hbm [resolvable:$true] %s1114_s11 }
 0x3f6   : > { %s1116_s15 = scalar_lea.hbm %s1115_s11, 4  ;;  %p1121_p8 = scmp.lt.s32.totalorder %s1115_s11, %s1543_s9 }
 0x3f7   : > { %p1117_p1 = scmp.ne.s32.totalorder %s1115_s11, %s1116_s15  ;;  %p1122_p7 = scmp.lt.s32.totalorder %s1120_s24, %s1116_s15 }
 0x3f8   : > { %725 = vrot.lane.b32.xlu2 %v724_v39, %s1189_s18 }
 0x3f9   : > { %p1118_p5 = pnand %p1117_p1, %p1303_p13  ;;  %p1123_p9 = por %p1122_p7, %p1121_p8 }
 0x3fb   : > { %p1119_p12 = pneg %p1118_p5 }
 0x3fd   : > { %p1124_p10 = pnand %p1123_p9, %p1119_p12 }
 0x442   : > { %v759_v5 = vpop.permute.xlu2 %758 }
 0x443   : > { %783 = vrot.lane.b32.xlu1 %v759_v5, %s1191_s19 }
 0x44a   : > { %v748_v7 = vpop.permute.xlu2 %747 }
 0x44b   : > { %810 = vperm.xlu1 %1028, %v807_v37  }
 0x452   : > { %v726_v17 = vpop.permute.xlu2 %725 }
 0x45c   : > { %v743_v8 = vpop.permute.xlu1 %742  ;;  %v754_v9 = vpop.permute.xlu0 %753 }
 0x45d   : > { %v771_v10 = vsel %vm760_vm3, %v737_v6, %v743_v8 }
 0x45e   : > { %v773_v11 = vsel %vm571_vm1, %v771_v10, %v748_v7 }
 0x45f   : > { %v775_v12 = vsel %vm766_vm4, %v773_v11, %v754_v9 }
 0x460   : > { %781 = vrot.lane.b32.xlu2 %v775_v12, %s1191_s19 }
 0x464   : > { %v721_v16 = vpop.permute.xlu1 %720  ;;  %v732_v23 = vpop.permute.xlu0 %731 }
 0x465   : > { %v763_v18 = vsel %vm760_vm3, %v699_v14, %v721_v16 }
 0x466   : > { %v765_v25 = vsel %vm571_vm1, %v763_v18, %v726_v17 }
 0x467   : > { %v768_v26 = vsel %vm766_vm4, %v765_v25, %v732_v23 }
 0x468   : > { %817 = vperm.xlu2 %1029, %v814_v19   ;;  %779 = vrot.lane.b32.xlu0 %v768_v26, %s1191_s19  ;;  %s1555_s19 = sshll.u32 %s1338_s29, 2 }
 0x469   : > { %s379_s0 = scalar_lea.vmem [#allocation7], %s1555_s19 }
 0x46a   : > { %s837_s20 = sshll.u32 %s379_s0, 4  ;;  %s838_s20 = int_to_ptr.vmem [resolvable:$true] %s837_s20 }
 0x4b5   : > { %v784_v35 = vpop.permute.xlu1 %783 }
 0x4b6   : > { %v792_v27 = vsel %vm760_vm3, %v784_v35, 0 }
 0x4b7   : > { %799 = vmatpush.bf16.msra.mxu2 %v792_v27 }
 0x4ba   : > { %v782_v28 = vpop.permute.xlu2 %781 }
 0x4bb   : > { %800 = vmatpush.bf16.msra.mxu2 %v782_v28 }
 0x4bd   : > { %v811_v31 = vpop.permute.xlu1 %810 }
 0x4c2   : > { %v818_v36 = vpop.permute.xlu2 %817 }
 0x4da   : > { %v780_v29 = vpop.permute.xlu0 %779 }
 0x4db   : > { %801 = vmatpush.bf16.msra.mxu2 %v780_v29 }
 0x4de   : > { %946 = vmatmul.msk.bf16.vlgmr.msra.gmra.mxu2 %vm787_vm5, %v776_v30 }
 0x561   : > { %v803_v32 = vpop.f32.mrf.mxu2 }
 0x562   : > { %v813_v34 = vmul.f32 %v811_v31, %v803_v32 }
 0x564   : > { %v820_v38 = vadd.f32 %v818_v36, %v813_v34 }
 0x566   : > { %v821_v40 = vmax.f32 %v820_v38, 0.0 }
 0x568   : > { %823 = vst.msk [vmem:[%s379_s0] sm:$0xf] %vm822_vm6, %v821_v40 }
 0x569   : > { %v805_v41 = vpop.f32.mrf.mxu2 }
 0x56a   : > { %1127 = shalt.err (!%p1124_p10)
}
 0x56b   : > { %957 = dma.vmem_to_hbm [thread:$0]  (%p1303_p13), %s838_s20, 64, %s840_s26, %s825_s16  }
 0x56c PF: > { %s851_s29 = sand.u32 1, %s1158_s30   ;;  %p1556_p11 = scmp.ge.s32.totalorder %s1170_s12, 2 }
 0x56d   : > { %s852_s27 = scalar_lea.sflag [#allocation4], %s851_s29 }
 0x56e   : > { %p968_p0 = pnand %p1556_p11, %p1308_p4 }
 0x570   : > { %p969_p2 = pneg %p968_p0 }
 0x572   : > { %1153 = dma.done.wait (%p969_p2), %s852_s27, 64  }
 0x573   : > { %1155 = vsyncadd (%p969_p2), %s852_s27, 4294967232  ;;  %s1557_s18 = sld [smem:[#allocation11_spill]]  ;;  %p23_p6 = scmp.ge.s32.totalorder %s1283_s23, 4  }
 0x574   : > { %s1558_s11 = sld [smem:[#allocation12_spill]]  ;;  %s1559_s30 = smov %s1162_s10 }
 0x575   : > { %s1561_s12 = smov %s1283_s23  ;;  %25 = sbr.rel (!%p23_p6) target bundleno = 8 (0x8), region = 117 }
 0x579   : > { %s1560_s10 = smov %s1557_s18 }
 0x57a   :  { %858 = vsyncpa [#allocation3], 1 }
 0x57b   :  { %860 = vsyncpa [#allocation3 + $0x1], 1 }
 0x57c   :  { %861 = vsyncpa [#allocation6], 1 }
 0x57d   :  { %863 = vsyncpa [#allocation6 + $0x1], 1 }
 0x57e   :  { %864 = vsyncpa [#allocation4], 1 }
 0x57f   :  { %866 = vsyncpa [#allocation4 + $0x1], 1 }

// kernel: tpu_custom_call.1
= control target key start
LH: loop header
LB: loop body
LE: loop exit
PB: predicated region body
PF: predicated region fallthrough
CT: control target
= control target key end

     0   :  { %14 = vsyncpa [#allocation3], 0  ;;  %s1893_s0 = inlined_call_operand.vmem [shape: f32[9,1,64], index: 0, kind: input, shape index: {}]   ;;  %s1894_s1 = inlined_call_operand.vmem [shape: bf16[2,8,64], index: 1, kind: input, shape index: {}]   ;;  %s1895_s2 = inlined_call_operand.vmem [shape: bf16[2,8,64], index: 2, kind: input, shape index: {}]   ;;  %s1896_s3 = inlined_call_operand.vmem [shape: bf16[18,4,8], index: 3, kind: input, shape index: {}]   ;;  %s1897_s4 = inlined_call_operand.vmem [shape: f32[4,1], index: 4, kind: input, shape index: {}]   ;;  %s1898_s5 = inlined_call_operand.vmem [shape: f32[4,1], index: 5, kind: input, shape index: {}]   ;;  %s1899_s6 = inlined_call_operand.vmem [shape: bf16[9,4,4], index: 6, kind: input, shape index: {}]   ;;  %s1900_s7 = inlined_call_operand.vmem [shape: f32[4,1], index: 7, kind: input, shape index: {}]   ;;  %s1901_s8 = inlined_call_operand.vmem [shape: f32[4,1], index: 8, kind: input, shape index: {}]   ;;  %s1902_s9 = inlined_call_operand.hbm [shape: f32[2,4,64], index: 9, kind: output, shape index: {}]  }
   0x1   :  { %16 = vsyncpa [#allocation3 + $0x1], 0  ;;  %s1538_s30 = smov 0   ;;  %s1540_s10 = smov 0  }
   0x2   :  { %s1542_s11 = smov 0   ;;  %s1544_s12 = smov 0  }
   0x3 LB: > { %s1559_s13 = sadd.s32 4294967295, %s1468_s12   ;;  %s1266_s14 = sadd.s32 4294967294, %s1468_s12   ;;  %s1468_s12 = sphi %s1544_s12, %s1918_s12   ;;  %s1464_s11 = sphi %s1542_s11, %s1917_s11   ;;  %s1460_s10 = sphi %s1540_s10, %s1916_s10   ;;  %s1456_s30 = sphi %s1538_s30, %s1915_s30  }
   0x4   : > { %s1563_s15 = sadd.s32 1, %s1468_s12   ;;  %s228_s16 = sadd.s32 1, %s1464_s11 }
   0x5   : > { %s225_s17 = ssub.s32 %s1468_s12, %s1563_s15  ;;  %p238_p0 = scmp.ne.s32.totalorder %s1464_s11, %s1460_s10 }
   0x6   : > { %p226_p1 = scmp.eq.s32.totalorder %s225_s17, 0  ;;  %p239_p2 = scmp.eq.s32.totalorder %s1559_s13, 1 }
   0x7   : > { %p244_p3 = scmp.ne.s32.totalorder %s1460_s10, %s1456_s30  ;;  %p245_p4 = scmp.eq.s32.totalorder %s1266_s14, 1 }
   0x8   : > { %s1574_s18 = scalar_select %p226_p1, %s1464_s11, %s228_s16  }
   0x9   : > { %p1576_p5 = por %p239_p2, %p238_p0  ;;  %p1580_p6 = por %p245_p4, %p244_p3 }
   0xa   : > { %p1269_p7 = scmp.ge.s32.totalorder %s1468_s12, 1  ;;  %p298_p8 = scmp.lt.s32.totalorder %s1468_s12, 3 }
   0xc   : > { %p299_p9 = pnand %p1269_p7, %p298_p8 }
   0xd   : > { %p337_p10 = scmp.lt.s32.totalorder (!%p299_p9), %s1559_s13, 1  ;;  %s1470_s29 = smov (!%p299_p9), 64  }
   0xe   : > { %302 = sbr.rel (%p299_p9) target bundleno = 1109 (0x455), region = 56  ;;  %s1471_s17 = smov (!%p299_p9), 63  }
   0xf   : > { %s1473_s26 = smov (!%p299_p9), 55   ;;  %s1474_s14 = smov (!%p299_p9), 57  }
  0x10   : > { %s1476_s24 = smov (!%p299_p9), 56   ;;  %s1477_s27 = smov (!%p299_p9), 1  }
  0x11   : > { %s1478_s16 = smov (!%p299_p9), 9   ;;  %s1481_s23 = smov (!%p299_p9), 72  }
  0x13   : > { %s338_s21 = scalar_select %p337_p10, %s1559_s13, 1  ;;  %v1397_v4 = vld [vmem:[%s1893_s0 + $0x3] ss:$0 sm:$0xff]  ;;  %v1398_v5 = vld [vmem:[%s1893_s0 + $0x7] ss:$0 sm:$0xff]  ;;  %vm348_vm0 = vcmask 1048064  }
  0x14   : > { %v1399_v6 = vld [vmem:[%s1893_s0] ss:$0 sm:$0xff]  ;;  %v1401_v7 = vld [vmem:[%s1893_s0 + $0x2] ss:$0 sm:$0xff]  ;;  %v1403_v8 = vld [vmem:[%s1893_s0 + $0x6] ss:$0 sm:$0xff] }
  0x15   : > { %s1271_s22 = sshll.u32 %s338_s21, 2  ;;  %358 = vrot.lane.b32.xlu2 %v1399_v6, %s1473_s26  ;;  %s1475_s21 = smov 7   ;;  %v1400_v11 = vld [vmem:[%s1893_s0 + $0x1] ss:$0 sm:$0xff]  ;;  %v1402_v14 = vld [vmem:[%s1893_s0 + $0x5] ss:$0 sm:$0xff] }
  0x16   : > { %s340_s25 = scalar_lea.vmem %s1894_s1, %s1271_s22  ;;  %s344_s28 = scalar_lea.vmem %s1895_s2, %s1271_s22  ;;  %v1404_v15 = vld [vmem:[%s1893_s0 + $0x8] ss:$0 sm:$0xff]  ;;  %vm469_vm1 = vcmask 1043456   ;;  %v1284_v62 = vld [vmem:[%s1896_s3 + $0x4] sm:$0x3]  ;;  %vm465_vm2 = vcmask 64512  }
  0x17   : > { %v346_v0 = vld [vmem:[%s340_s25] sm:$0xf]  ;;  %s1472_s25 = smov 8   ;;  %s1904_s22 = smov 121   ;;  %vm951_vm3 = vcmask 1041408   ;;  %vm947_vm4 = vcmask 31744  }
  0x18   : > { %v1591_v1 = vunpack.c.l.bf16 %v346_v0  ;;  %v433_v2 = vld [vmem:[%s344_s28] sm:$0xf]  ;;  %s1907_s26 = smov 119   ;;  %vm1177_vm5 = vcmask 519168  }
  0x19   : > { %v1598_v3 = vunpack.c.l.bf16 %v433_v2  ;;  %v1292_v2 = vld [vmem:[%s1896_s3 + $0xc] sm:$0x3] }
  0x1a   : > { %349 = vrot.lane.b32.xlu0 %v1591_v1, %s1470_s29 }
  0x1d   : > { %376 = vrot.lane.b32.xlu2 %v1401_v7, %s1474_s14 }
  0x22   : > { %435 = vrot.lane.b32.xlu0 %v1598_v3, %s1470_s29 }
  0x25   : > { %410 = vrot.lane.b32.xlu2 %v1403_v8, %s1475_s21  ;;  %s1480_s21 = smov 71   ;;  %v459_v8 = vld [vmem:[%s1896_s3] sm:$0x3] }
  0x2a   : > { %385 = vrot.lane.b32.xlu0 %v1397_v4, %s1471_s17  ;;  %s1479_s17 = smov 73   ;;  %v1696_v4 = vld [vmem:[%s1893_s0 + $0x4] ss:$0 sm:$0xff] }
  0x32   : > { %419 = vrot.lane.b32.xlu0 %v1398_v5, %s1472_s25  ;;  %s1906_s25 = smov 65   ;;  %v395_v5 = vmul.f32 %v1696_v4, %v1591_v1 }
  0x6f   : > { %v1632_v16 = vpop.permute.xlu2 %358 }
  0x77   : > { %v1634_v17 = vpop.permute.xlu2 %376 }
  0x7f   : > { %v1638_v20 = vpop.permute.xlu2 %410 }
  0x8c   : > { %v350_v9 = vpop.permute.xlu0 %349 }
  0x8d   : > { %v351_v10 = vsel %vm348_vm0, %v350_v9, %v1591_v1  ;;  %v396_v9 = vpack.c.bf16 %v395_v5, %v395_v5 }
  0x8e   : > { %352 = vrot.lane.b32.xlu1 %v351_v10, %s1470_s29 }
  0x94   : > { %v436_v12 = vpop.permute.xlu0 %435 }
  0x95   : > { %v437_v13 = vsel %vm348_vm0, %v436_v12, %v1598_v3 }
  0x96   : > { %367 = vrot.lane.b32.xlu1 %v1400_v11, %s1476_s24  ;;  %438 = vrot.lane.b32.xlu2 %v437_v13, %s1470_s29  ;;  %s1905_s24 = smov 127   ;;  %v564_v11 = vsel %vm469_vm1, %v396_v9, 0  ;;  %v449_v13 = vmul.f32 %v1696_v4, %v1598_v3 }
  0x9c   : > { %v1648_v28 = vpop.permute.xlu0 %385 }
  0x9e   : > { %401 = vrot.lane.b32.xlu1 %v1402_v14, %s1477_s27  ;;  %s1903_s27 = smov 120  }
  0xa4   : > { %v1659_v39 = vpop.permute.xlu0 %419 }
  0xa6   : > { %428 = vrot.lane.b32.xlu1 %v1404_v15, %s1478_s16 }
  0xf0   : > { %v439_v30 = vpop.permute.xlu2 %438 }
  0xf1   : > { %v440_v32 = vsel %vm348_vm0, %v439_v30, %v1598_v3  ;;  %v1290_v3 = vld [vmem:[%s1896_s3 + $0xa] sm:$0x3] }
  0xf2   : > { %v441_v35 = vmul.f32 %v440_v32, %v1632_v16  ;;  %v447_v43 = vmul.f32 %v440_v32, %v1648_v28  ;;  %v455_v48 = vmul.f32 %v440_v32, %v1659_v39  ;;  %v445_v50 = vmul.f32 %v440_v32, %v1634_v17 }
  0xf3   : > { %v453_v55 = vmul.f32 %v440_v32, %v1638_v20 }
  0xf4   : > { %v442_v40 = vpack.c.bf16 %v441_v35, %v441_v35  ;;  %v448_v47 = vpack.c.bf16 %v447_v43, %v447_v43  ;;  %v456_v51 = vpack.c.bf16 %v455_v48, %v455_v48  ;;  %v446_v52 = vpack.c.bf16 %v445_v50, %v445_v50  ;;  %v1300_v43 = vld [vmem:[%s1896_s3 + $0x14] sm:$0x3]  ;;  %v1296_v50 = vld [vmem:[%s1896_s3 + $0x10] sm:$0x3] }
  0xf5   : > { %v454_v56 = vpack.c.bf16 %v453_v55, %v453_v55 }
 0x100   : > { %v353_v18 = vpop.permute.xlu1 %352 }
 0x101   : > { %v354_v19 = vsel %vm348_vm0, %v353_v18, %v1591_v1  ;;  %v1281_v1 = vld [vmem:[%s1896_s3 + $0x2] sm:$0x3] }
 0x102   : > { %v361_v21 = vmul.f32 %v1632_v16, %v354_v19  ;;  %v379_v22 = vmul.f32 %v1634_v17, %v354_v19  ;;  %v413_v26 = vmul.f32 %v1638_v20, %v354_v19  ;;  %v388_v33 = vmul.f32 %v1648_v28, %v354_v19 }
 0x103   : > { %v422_v41 = vmul.f32 %v1659_v39, %v354_v19 }
 0x104   : > { %v362_v23 = vpack.c.bf16 %v361_v21, %v361_v21  ;;  %v380_v24 = vpack.c.bf16 %v379_v22, %v379_v22  ;;  %v414_v31 = vpack.c.bf16 %v413_v26, %v413_v26  ;;  %v389_v38 = vpack.c.bf16 %v388_v33, %v388_v33  ;;  %v1288_v33 = vld [vmem:[%s1896_s3 + $0x8] sm:$0x3] }
 0x105   : > { %v423_v46 = vpack.c.bf16 %v422_v41, %v422_v41  ;;  %v1294_v41 = vld [vmem:[%s1896_s3 + $0xe] sm:$0x3] }
 0x106   : > { %487 = vrot.lane.b32.xlu1 %v362_v23, %s1479_s17  ;;  %511 = vrot.lane.b32.xlu2 %v380_v24, %s1480_s21  ;;  %v1286_v24 = vld [vmem:[%s1896_s3 + $0x6] sm:$0x3] }
 0x108   : > { %v1644_v25 = vpop.permute.xlu1 %367 }
 0x109   : > { %v370_v27 = vmul.f32 %v1644_v25, %v354_v19  ;;  %v443_v49 = vmul.f32 %v440_v32, %v1644_v25 }
 0x10b   : > { %v371_v29 = vpack.c.bf16 %v370_v27, %v370_v27  ;;  %v444_v53 = vpack.c.bf16 %v443_v49, %v443_v49 }
 0x10d   : > { %463 = vrot.lane.b32.xlu0 %v371_v29, %s1481_s23 }
 0x10e   : > { %608 = vrot.lane.b32.xlu2 %v414_v31, %s1904_s22 }
 0x110   : > { %v1655_v34 = vpop.permute.xlu1 %401 }
 0x111   : > { %v404_v36 = vmul.f32 %v1655_v34, %v354_v19  ;;  %v451_v54 = vmul.f32 %v440_v32, %v1655_v34 }
 0x113   : > { %v405_v37 = vpack.c.bf16 %v404_v36, %v404_v36  ;;  %v452_v57 = vpack.c.bf16 %v451_v54, %v451_v54  ;;  %v1487_v54 = vmov 0  }
 0x114   : > { %1394 = vset.pattern.permute.xlu1 %v1487_v54  ;;  %1395 = vset.pattern.permute.xlu2 %v1487_v54 }
 0x115   : > { %583 = vrot.lane.b32.xlu1 %v405_v37, %s1905_s24  ;;  %536 = vrot.lane.b32.xlu0 %v389_v38, %s1906_s25 }
 0x116   : > { %683 = vrot.lane.b32.xlu2 %v442_v40, %s1479_s17  ;;  %1396 = vset.pattern.permute.xlu0 %v1487_v54 }
 0x118   : > { %v1665_v42 = vpop.permute.xlu1 %428 }
 0x119   : > { %v431_v44 = vmul.f32 %v1665_v42, %v354_v19  ;;  %v457_v58 = vmul.f32 %v440_v32, %v1665_v42  ;;  %v450_v19 = vpack.c.bf16 %v449_v13, %v449_v13 }
 0x11b   : > { %v432_v45 = vpack.c.bf16 %v431_v44, %v431_v44  ;;  %v458_v59 = vpack.c.bf16 %v457_v58, %v457_v58  ;;  %v786_v26 = vsel %vm469_vm1, %v450_v19, 0  ;;  %v1298_v44 = vld [vmem:[%s1896_s3 + $0x12] sm:$0x3]  ;;  %v1308_v58 = vld [vmem:[%s1896_s3 + $0x1c] sm:$0x3] }
 0x11d   : > { %658 = vrot.lane.b32.xlu1 %v432_v45, %s1907_s26  ;;  %633 = vrot.lane.b32.xlu0 %v423_v46, %s1903_s27 }
 0x11e   : > { %758 = vrot.lane.b32.xlu2 %v448_v47, %s1906_s25  ;;  %s1911_s25 = smov 65  }
 0x125   : > { %733 = vrot.lane.b32.xlu1 %v446_v52, %s1480_s21  ;;  %708 = vrot.lane.b32.xlu0 %v444_v53, %s1481_s23  ;;  %v902_v52 = vld [vmem:[%s1897_s4] sm:$0xf] }
 0x126   : > { %855 = vrot.lane.b32.xlu2 %v456_v51, %s1903_s27  ;;  %v909_v53 = vld [vmem:[%s1898_s5] sm:$0xf]  ;;  %s1914_s27 = smov 120  }
 0x12d   : > { %830 = vrot.lane.b32.xlu1 %v454_v56, %s1904_s22  ;;  %805 = vrot.lane.b32.xlu0 %v452_v57, %s1905_s24  ;;  %v1302_v57 = vld [vmem:[%s1896_s3 + $0x16] sm:$0x3] }
 0x12e   : > { %912 = vperm.xlu2 %1395, %v909_v53  }
 0x135   : > { %880 = vrot.lane.b32.xlu0 %v458_v59, %s1907_s26  ;;  %905 = vperm.xlu1 %1394, %v902_v52   ;;  %v1306_v59 = vld [vmem:[%s1896_s3 + $0x1a] sm:$0x3]  ;;  %s1912_s26 = smov 127  }
 0x160   : > { %v512_v60 = vpop.permute.xlu2 %511 }
 0x161   : > { %v517_v61 = vsel %vm469_vm1, %v512_v60, 0  ;;  %v1304_v60 = vld [vmem:[%s1896_s3 + $0x18] sm:$0x3] }
 0x162   : > { %526 = vmatpush.bf16.msra.mxu2 %v517_v61  ;;  %v1310_v61 = vld [vmem:[%s1896_s3 + $0x1e] sm:$0x3] }
 0x165   : > { %1285 = vmatmul.msk.bf16.vlgmr.msra.gmra.mxu2 %vm465_vm2, %v1284_v62  ;;  %v1314_v62 = vld [vmem:[%s1896_s3 + $0x22] sm:$0x3] }
 0x168   : > { %v609_v63 = vpop.permute.xlu2 %608 }
 0x169   : > { %v614_v0 = vsel %vm469_vm1, %v609_v63, 0  ;;  %v1312_v63 = vld [vmem:[%s1896_s3 + $0x20] sm:$0x3] }
 0x16a   : > { %623 = vmatpush.bf16.msrb.mxu2 %v614_v0 }
 0x170   : > { %v684_v14 = vpop.permute.xlu2 %683 }
 0x171   : > { %v689_v23 = vsel %vm469_vm1, %v684_v14, 0 }
 0x175   : > { %1293 = vmatmul.msk.bf16.vlgmr.msrb.gmra.mxu2 %vm465_vm2, %v1292_v2 }
 0x178   : > { %v488_v6 = vpop.permute.xlu1 %487  ;;  %v759_v32 = vpop.permute.xlu2 %758 }
 0x179   : > { %v493_v7 = vsel %vm469_vm1, %v488_v6, 0  ;;  %v764_v35 = vsel %vm469_vm1, %v759_v32, 0 }
 0x17a   : > { %502 = vmatpush.bf16.msra.mxu1 %v493_v7 }
 0x17d   : > { %1283 = vmatmul.msk.bf16.vlgmr.msra.gmra.mxu1 %vm465_vm2, %v459_v8 }
 0x17f   : > { %v464_v10 = vpop.permute.xlu0 %463 }
 0x180   : > { %v471_v12 = vsel %vm469_vm1, %v464_v10, 0  ;;  %v856_v49 = vpop.permute.xlu2 %855 }
 0x181   : > { %480 = vmatpush.bf16.msra.mxu0 %v471_v12  ;;  %v861_v51 = vsel %vm469_vm1, %v856_v49, 0 }
 0x184   : > { %1282 = vmatmul.msk.bf16.vlgmr.msra.gmra.mxu0 %vm465_vm2, %v1281_v1 }
 0x185   : > { %573 = vmatpush.bf16.msrb.mxu0 %v564_v11 }
 0x187   : > { %v584_v15 = vpop.permute.xlu1 %583  ;;  %v537_v18 = vpop.permute.xlu0 %536 }
 0x188   : > { %v542_v21 = vsel %vm469_vm1, %v537_v18, 0  ;;  %v589_v22 = vsel %vm469_vm1, %v584_v15, 0 }
 0x189   : > { %551 = vmatpush.bf16.msra.mxu3 %v542_v21  ;;  %598 = vmatpush.bf16.msrb.mxu1 %v589_v22 }
 0x18c   : > { %1287 = vmatmul.msk.bf16.vlgmr.msra.gmra.mxu3 %vm465_vm2, %v1286_v24 }
 0x18d   : > { %698 = vmatpush.bf16.msra.mxu1 %v689_v23 }
 0x18e   : > { %1291 = vmatmul.msk.bf16.vlgmr.msrb.gmra.mxu1 %vm465_vm2, %v1290_v3 }
 0x18f   : > { %v659_v27 = vpop.permute.xlu1 %658  ;;  %v634_v29 = vpop.permute.xlu0 %633 }
 0x190   : > { %v664_v30 = vsel %vm469_vm1, %v659_v27, 0  ;;  %v639_v31 = vsel %vm469_vm1, %v634_v29, 0 }
 0x191   : > { %795 = vmatpush.bf16.msrb.mxu1 %v786_v26  ;;  %648 = vmatpush.bf16.msrb.mxu3 %v639_v31 }
 0x192   : > { %673 = vmatpush.bf16.msra.mxu0 %v664_v30 }
 0x194   : > { %1289 = vmatmul.msk.bf16.vlgmr.msrb.gmra.mxu0 %vm465_vm2, %v1288_v33 }
 0x196   : > { %773 = vmatpush.bf16.msrb.mxu0 %v764_v35 }
 0x197   : > { %v734_v36 = vpop.permute.xlu1 %733  ;;  %v709_v37 = vpop.permute.xlu0 %708 }
 0x198   : > { %v739_v38 = vsel %vm469_vm1, %v734_v36, 0  ;;  %v714_v40 = vsel %vm469_vm1, %v709_v37, 0 }
 0x199   : > { %723 = vmatpush.bf16.msra.mxu2 %v714_v40  ;;  %748 = vmatpush.bf16.msra.mxu3 %v739_v38 }
 0x19c   : > { %1295 = vmatmul.msk.bf16.vlgmr.msrb.gmra.mxu3 %vm465_vm2, %v1294_v41  ;;  %1301 = vmatmul.msk.bf16.vlgmr.msra.gmra.mxu2 %vm465_vm2, %v1300_v43 }
 0x19e   : > { %1299 = vmatmul.msk.bf16.vlgmr.msra.gmra.mxu1 %vm465_vm2, %v1298_v44 }
 0x19f   : > { %v831_v45 = vpop.permute.xlu1 %830  ;;  %v806_v46 = vpop.permute.xlu0 %805 }
 0x1a0   : > { %v836_v47 = vsel %vm469_vm1, %v831_v45, 0  ;;  %v811_v48 = vsel %vm469_vm1, %v806_v46, 0 }
 0x1a1   : > { %820 = vmatpush.bf16.msrb.mxu2 %v811_v48  ;;  %845 = vmatpush.bf16.msrb.mxu3 %v836_v47 }
 0x1a4   : > { %1297 = vmatmul.msk.bf16.vlgmr.msra.gmra.mxu0 %vm465_vm2, %v1296_v50 }
 0x1a5   : > { %870 = vmatpush.bf16.msra.mxu0 %v861_v51 }
 0x1a7   : > { %v881_v55 = vpop.permute.xlu0 %880 }
 0x1a8   : > { %v886_v56 = vsel %vm469_vm1, %v881_v55, 0 }
 0x1a9   : > { %895 = vmatpush.bf16.msra.mxu1 %v886_v56 }
 0x1ac   : > { %1303 = vmatmul.msk.bf16.vlgmr.msra.gmra.mxu3 %vm465_vm2, %v1302_v57  ;;  %1309 = vmatmul.msk.bf16.vlgmr.msrb.gmra.mxu2 %vm465_vm2, %v1308_v58 }
 0x1ae   : > { %1307 = vmatmul.msk.bf16.vlgmr.msrb.gmra.mxu1 %vm465_vm2, %v1306_v59  ;;  %v906_v59 = vpop.permute.xlu1 %905 }
 0x1b4   : > { %1305 = vmatmul.msk.bf16.vlgmr.msrb.gmra.mxu0 %vm465_vm2, %v1304_v60 }
 0x1bc   : > { %1311 = vmatmul.msk.bf16.vlgmr.msrb.gmra.mxu3 %vm465_vm2, %v1310_v61  ;;  %v913_v61 = vpop.permute.xlu2 %912 }
 0x1be   : > { %1315 = vmatmul.msk.bf16.vlgmr.msra.gmra.mxu1 %vm465_vm2, %v1314_v62 }
 0x1c4   : > { %1313 = vmatmul.msk.bf16.vlgmr.msra.gmra.mxu0 %vm465_vm2, %v1312_v63 }
 0x1e8   : > { %v528_v0 = vpop.f32.mrf.mxu2 }
 0x1f0   : > { %v530_v2 = vpop.f32.mrf.mxu2 }
 0x1f8   : > { %v625_v5 = vpop.f32.mrf.mxu2 }
 0x1fa   : > { %v504_v6 = vpop.f32.mrf.mxu1 }
 0x200   : > { %v627_v7 = vpop.f32.mrf.mxu2 }
 0x201   : > { %v482_v8 = vpop.f32.mrf.mxu0 }
 0x202   : > { %v506_v9 = vpop.f32.mrf.mxu1  ;;  %v505_v1 = vadd.f32 %v504_v6, %v482_v8 }
 0x204   : > { %v532_v15 = vadd.f32 %v528_v0, %v505_v1 }
 0x209   : > { %v484_v10 = vpop.f32.mrf.mxu0 }
 0x20b   : > { %v600_v11 = vpop.f32.mrf.mxu1 }
 0x20f   : > { %v553_v12 = vpop.f32.mrf.mxu3 }
 0x210   : > { %v557_v18 = vadd.f32 %v553_v12, %v532_v15 }
 0x211   : > { %v575_v13 = vpop.f32.mrf.mxu0 }
 0x212   : > { %v579_v22 = vadd.f32 %v575_v13, %v557_v18 }
 0x213   : > { %v602_v14 = vpop.f32.mrf.mxu1 }
 0x214   : > { %v604_v24 = vadd.f32 %v600_v11, %v579_v22 }
 0x216   : > { %v629_v29 = vadd.f32 %v625_v5, %v604_v24 }
 0x217   : > { %v555_v19 = vpop.f32.mrf.mxu3 }
 0x219   : > { %v577_v21 = vpop.f32.mrf.mxu0 }
 0x21b   : > { %v700_v23 = vpop.f32.mrf.mxu1 }
 0x21f   : > { %v650_v3 = vpop.f32.mrf.mxu3  ;;  %v725_v26 = vpop.f32.mrf.mxu2 }
 0x220   : > { %v654_v31 = vadd.f32 %v650_v3, %v629_v29 }
 0x221   : > { %v675_v27 = vpop.f32.mrf.mxu0 }
 0x222   : > { %v679_v35 = vadd.f32 %v675_v27, %v654_v31  ;;  %v1316_v27 = vld [vmem:[%s1899_s6 + $0x2] sm:$0x3]  ;;  %v1323_v31 = vld [vmem:[%s1899_s6 + $0x8] sm:$0x3] }
 0x223   : > { %v702_v30 = vpop.f32.mrf.mxu1 }
 0x224   : > { %v704_v38 = vadd.f32 %v700_v23, %v679_v35 }
 0x226   : > { %v729_v43 = vadd.f32 %v725_v26, %v704_v38 }
 0x227   : > { %v652_v32 = vpop.f32.mrf.mxu3  ;;  %v727_v33 = vpop.f32.mrf.mxu2 }
 0x229   : > { %v677_v36 = vpop.f32.mrf.mxu0 }
 0x22b   : > { %v797_v37 = vpop.f32.mrf.mxu1 }
 0x22f   : > { %v750_v40 = vpop.f32.mrf.mxu3  ;;  %v822_v41 = vpop.f32.mrf.mxu2 }
 0x230   : > { %v754_v45 = vadd.f32 %v750_v40, %v729_v43  ;;  %v1319_v40 = vld [vmem:[%s1899_s6 + $0x4] sm:$0x3] }
 0x231   : > { %v775_v44 = vpop.f32.mrf.mxu0 }
 0x232   : > { %v779_v47 = vadd.f32 %v775_v44, %v754_v45 }
 0x233   : > { %v799_v46 = vpop.f32.mrf.mxu1 }
 0x234   : > { %v801_v51 = vadd.f32 %v797_v37, %v779_v47  ;;  %v1331_v47 = vld [vmem:[%s1899_s6 + $0x10] sm:$0x3] }
 0x236   : > { %v826_v53 = vadd.f32 %v822_v41, %v801_v51  ;;  %v941_v41 = vld [vmem:[%s1899_s6] sm:$0x3]  ;;  %v1325_v51 = vld [vmem:[%s1899_s6 + $0xa] sm:$0x3] }
 0x237   : > { %v752_v48 = vpop.f32.mrf.mxu3  ;;  %v824_v49 = vpop.f32.mrf.mxu2 }
 0x239   : > { %v777_v50 = vpop.f32.mrf.mxu0 }
 0x23a   : > { %v1327_v50 = vld [vmem:[%s1899_s6 + $0xc] sm:$0x3] }
 0x23b   : > { %v897_v52 = vpop.f32.mrf.mxu1 }
 0x23f   : > { %v847_v54 = vpop.f32.mrf.mxu3 }
 0x240   : > { %v851_v55 = vadd.f32 %v847_v54, %v826_v53 }
 0x241   : > { %v872_v56 = vpop.f32.mrf.mxu0 }
 0x242   : > { %v876_v57 = vadd.f32 %v872_v56, %v851_v55 }
 0x243   : > { %v899_v58 = vpop.f32.mrf.mxu1 }
 0x244   : > { %v901_v60 = vadd.f32 %v897_v52, %v876_v57  ;;  %v1329_v52 = vld [vmem:[%s1899_s6 + $0xe] sm:$0x3] }
 0x246   : > { %v908_v62 = vmul.f32 %v906_v59, %v901_v60 }
 0x247   : > { %v849_v63 = vpop.f32.mrf.mxu3 }
 0x248   : > { %v915_v0 = vadd.f32 %v913_v61, %v908_v62 }
 0x249   : > { %v874_v2 = vpop.f32.mrf.mxu0 }
 0x24a   : > { %v916_v5 = vmax.f32 %v915_v0, 0.0 }
 0x24c   : > { %917 = vrot.lane.b32.xlu0 %v916_v5, %s1470_s29 }
 0x2be   : > { %v918_v6 = vpop.permute.xlu0 %917 }
 0x2bf   : > { %v919_v7 = vsel %vm348_vm0, %v918_v6, %v916_v5 }
 0x2c0   : > { %920 = vrot.lane.b32.xlu1 %v919_v7, %s1470_s29  ;;  %s1910_s29 = smov 119  }
 0x332   : > { %v921_v8 = vpop.permute.xlu1 %920 }
 0x333   : > { %v922_v9 = vsel %vm348_vm0, %v921_v8, %v916_v5 }
 0x334   : > { %v927_v10 = vmul.f32 %v922_v9, %v1634_v17  ;;  %v925_v11 = vmul.f32 %v922_v9, %v1644_v25  ;;  %v923_v12 = vmul.f32 %v922_v9, %v1632_v16  ;;  %v939_v15 = vmul.f32 %v922_v9, %v1665_v42  ;;  %v1162_v42 = vld [vmem:[%s1900_s7] sm:$0xf] }
 0x335   : > { %v929_v18 = vmul.f32 %v922_v9, %v1648_v28  ;;  %v933_v19 = vmul.f32 %v922_v9, %v1655_v34  ;;  %v935_v16 = vmul.f32 %v922_v9, %v1638_v20  ;;  %v937_v22 = vmul.f32 %v922_v9, %v1659_v39  ;;  %v1169_v34 = vld [vmem:[%s1901_s8] sm:$0xf] }
 0x336   : > { %v928_v1 = vpack.c.bf16 %v927_v10, %v927_v10  ;;  %v926_v13 = vpack.c.bf16 %v925_v11, %v925_v11  ;;  %v924_v14 = vpack.c.bf16 %v923_v12, %v923_v12  ;;  %v940_v17 = vpack.c.bf16 %v939_v15, %v939_v15 }
 0x337   : > { %v930_v21 = vpack.c.bf16 %v929_v18, %v929_v18  ;;  %v934_v25 = vpack.c.bf16 %v933_v19, %v933_v19  ;;  %v936_v28 = vpack.c.bf16 %v935_v16, %v935_v16  ;;  %v938_v23 = vpack.c.bf16 %v937_v22, %v937_v22 }
 0x338   : > { %993 = vrot.lane.b32.xlu1 %v928_v1, %s1480_s21  ;;  %945 = vrot.lane.b32.xlu2 %v926_v13, %s1481_s23  ;;  %s1913_s23 = smov 121   ;;  %v931_v20 = vmul.f32 %v1696_v4, %v916_v5  ;;  %v1321_v4 = vld [vmem:[%s1899_s6 + $0x6] sm:$0x3] }
 0x339   : > { %969 = vrot.lane.b32.xlu0 %v924_v14, %s1479_s17  ;;  %s334_s17 = sand.u32 1, %s1460_s10  }
 0x33a   : > { %v932_v24 = vpack.c.bf16 %v931_v20, %v931_v20  ;;  %s1270_s21 = sshll.u32 %s334_s17, 2 }
 0x33b   : > { %s336_s14 = scalar_lea.vmem [#allocation2], %s1270_s21  ;;  %s1426_s21 = scalar_lea.hbm %s1902_s9, 8 }
 0x33c   : > { %v1046_v26 = vsel %vm951_vm3, %v932_v24, 0  ;;  %s1192_s22 = sshll.u32 %s336_s14, 4  ;;  %s1193_s22 = int_to_ptr.vmem [resolvable:$true] %s1192_s22 }
 0x340   : > { %1140 = vrot.lane.b32.xlu1 %v940_v17, %s1910_s29  ;;  %1018 = vrot.lane.b32.xlu2 %v930_v21, %s1911_s25 }
 0x341   : > { %1065 = vrot.lane.b32.xlu0 %v934_v25, %s1912_s26 }
 0x348   : > { %1165 = vperm.xlu1 %1394, %v1162_v42   ;;  %1090 = vrot.lane.b32.xlu2 %v936_v28, %s1913_s23  ;;  %s1334_s23 = sshll.u32 %s1559_s13, 2  ;;  %s1180_s13 = scalar_lea.sflag [#allocation3], %s334_s17 }
 0x349   : > { %1115 = vrot.lane.b32.xlu0 %v938_v23, %s1914_s27  ;;  %s1190_s28 = scalar_lea.hbm %s1902_s9, %s1334_s23 }
 0x34a   : > { %s1194_s24 = sshll.u32 %s1190_s28, 4  ;;  %s1195_s24 = int_to_ptr.hbm [resolvable:$true] %s1194_s24 }
 0x34b   : > { %s1420_s29 = sshra.s32 %s1195_s24, 4  ;;  %s1421_s29 = int_to_ptr.hbm [resolvable:$true] %s1420_s29 }
 0x34c   : > { %s1422_s25 = scalar_lea.hbm %s1421_s29, 4  ;;  %p1427_p0 = scmp.lt.s32.totalorder %s1421_s29, %s1902_s9 }
 0x34d   : > { %p1423_p11 = scmp.ne.s32.totalorder %s1421_s29, %s1422_s25  ;;  %p1428_p1 = scmp.lt.s32.totalorder %s1426_s21, %s1422_s25 }
 0x34f   : > { %p1424_p12 = pnand %p1423_p11, %p1576_p5  ;;  %p1429_p2 = por %p1428_p1, %p1427_p0 }
 0x350   : > { %1172 = vperm.xlu2 %1395, %v1169_v34  }
 0x351   : > { %p1425_p13 = pneg %p1424_p12 }
 0x353   : > { %p1430_p3 = pnand %p1429_p2, %p1425_p13 }
 0x392   : > { %v946_v39 = vpop.permute.xlu2 %945 }
 0x393   : > { %v953_v3 = vsel %vm951_vm3, %v946_v39, 0 }
 0x394   : > { %962 = vmatpush.bf16.msra.mxu2 %v953_v3 }
 0x397   : > { %1317 = vmatmul.msk.bf16.vlgmr.msra.gmra.mxu2 %vm947_vm4, %v1316_v27 }
 0x398   : > { %1055 = vmatpush.bf16.msrb.mxu2 %v1046_v26 }
 0x39a   : > { %v1019_v29 = vpop.permute.xlu2 %1018 }
 0x39b   : > { %v1024_v30 = vsel %vm951_vm3, %v1019_v29, 0 }
 0x39c   : > { %1033 = vmatpush.bf16.msrb.mxu1 %v1024_v30 }
 0x39f   : > { %1322 = vmatmul.msk.bf16.vlgmr.msrb.gmra.mxu1 %vm947_vm4, %v1321_v4 }
 0x3a2   : > { %v1091_v32 = vpop.permute.xlu2 %1090 }
 0x3a3   : > { %v1096_v37 = vsel %vm951_vm3, %v1091_v32, 0 }
 0x3a7   : > { %1324 = vmatmul.msk.bf16.vlgmr.msrb.gmra.mxu2 %vm947_vm4, %v1323_v31 }
 0x3aa   : > { %v994_v33 = vpop.permute.xlu1 %993  ;;  %v1173_v21 = vpop.permute.xlu2 %1172 }
 0x3ab   : > { %v999_v35 = vsel %vm951_vm3, %v994_v33, 0  ;;  %v970_v36 = vpop.permute.xlu0 %969 }
 0x3ac   : > { %v975_v38 = vsel %vm951_vm3, %v970_v36, 0  ;;  %1008 = vmatpush.bf16.msrb.mxu0 %v999_v35 }
 0x3ad   : > { %984 = vmatpush.bf16.msra.mxu3 %v975_v38 }
 0x3af   : > { %1320 = vmatmul.msk.bf16.vlgmr.msrb.gmra.mxu0 %vm947_vm4, %v1319_v40 }
 0x3b0   : > { %1105 = vmatpush.bf16.msra.mxu0 %v1096_v37  ;;  %1318 = vmatmul.msk.bf16.vlgmr.msra.gmra.mxu3 %vm947_vm4, %v941_v41 }
 0x3b2   : > { %v1141_v43 = vpop.permute.xlu1 %1140 }
 0x3b3   : > { %v1146_v44 = vsel %vm951_vm3, %v1141_v43, 0  ;;  %v1066_v45 = vpop.permute.xlu0 %1065 }
 0x3b4   : > { %v1071_v46 = vsel %vm951_vm3, %v1066_v45, 0  ;;  %1155 = vmatpush.bf16.msra.mxu2 %v1146_v44 }
 0x3b5   : > { %1080 = vmatpush.bf16.msrb.mxu3 %v1071_v46 }
 0x3b7   : > { %1332 = vmatmul.msk.bf16.vlgmr.msra.gmra.mxu2 %vm947_vm4, %v1331_v47 }
 0x3ba   : > { %v1166_v18 = vpop.permute.xlu1 %1165 }
 0x3bb   : > { %v1116_v48 = vpop.permute.xlu0 %1115 }
 0x3bc   : > { %v1121_v49 = vsel %vm951_vm3, %v1116_v48, 0 }
 0x3bd   : > { %1130 = vmatpush.bf16.msra.mxu1 %v1121_v49 }
 0x3bf   : > { %1328 = vmatmul.msk.bf16.vlgmr.msra.gmra.mxu0 %vm947_vm4, %v1327_v50 }
 0x3c0   : > { %1326 = vmatmul.msk.bf16.vlgmr.msrb.gmra.mxu3 %vm947_vm4, %v1325_v51  ;;  %1330 = vmatmul.msk.bf16.vlgmr.msra.gmra.mxu1 %vm947_vm4, %v1329_v52 }
 0x41a   : > { %v964_v53 = vpop.f32.mrf.mxu2 }
 0x41c   : > { %v1035_v54 = vpop.f32.mrf.mxu1 }
 0x422   : > { %v966_v55 = vpop.f32.mrf.mxu2 }
 0x424   : > { %v1037_v56 = vpop.f32.mrf.mxu1 }
 0x42a   : > { %v1057_v57 = vpop.f32.mrf.mxu2 }
 0x42c   : > { %v1010_v58 = vpop.f32.mrf.mxu0 }
 0x432   : > { %v1059_v59 = vpop.f32.mrf.mxu2 }
 0x433   : > { %v986_v60 = vpop.f32.mrf.mxu3 }
 0x434   : > { %v1012_v61 = vpop.f32.mrf.mxu0  ;;  %v987_v62 = vadd.f32 %v986_v60, %v964_v53 }
 0x436   : > { %v1014_v63 = vadd.f32 %v1010_v58, %v987_v62 }
 0x438   : > { %v1039_v7 = vadd.f32 %v1035_v54, %v1014_v63 }
 0x43a   : > { %v1157_v0 = vpop.f32.mrf.mxu2  ;;  %v1061_v8 = vadd.f32 %v1057_v57, %v1039_v7 }
 0x43b   : > { %v988_v2 = vpop.f32.mrf.mxu3 }
 0x43c   : > { %v1107_v5 = vpop.f32.mrf.mxu0 }
 0x43d   : > { %v1132_v6 = vpop.f32.mrf.mxu1 }
 0x442   : > { %v1159_v9 = vpop.f32.mrf.mxu2 }
 0x443   : > { %v1082_v10 = vpop.f32.mrf.mxu3 }
 0x444   : > { %v1086_v11 = vadd.f32 %v1082_v10, %v1061_v8  ;;  %v1109_v12 = vpop.f32.mrf.mxu0 }
 0x445   : > { %v1134_v1 = vpop.f32.mrf.mxu1 }
 0x446   : > { %v1111_v13 = vadd.f32 %v1107_v5, %v1086_v11 }
 0x448   : > { %v1136_v14 = vadd.f32 %v1132_v6, %v1111_v13 }
 0x44a   : > { %v1161_v15 = vadd.f32 %v1157_v0, %v1136_v14 }
 0x44b   : > { %v1084_v19 = vpop.f32.mrf.mxu3 }
 0x44c   : > { %v1168_v17 = vmul.f32 %v1166_v18, %v1161_v15 }
 0x44e   : > { %v1175_v25 = vadd.f32 %v1173_v21, %v1168_v17 }
 0x450   : > { %v1176_v16 = vmax.f32 %v1175_v25, 0.0 }
 0x452   : > { %1178 = vst.msk [vmem:[%s336_s14] sm:$0xf] %vm1177_vm5, %v1176_v16 }
 0x453   : > { %1433 = shalt.err (!%p1430_p3)
}
 0x454   : > { %1337 = dma.vmem_to_hbm [thread:$0]  (%p1576_p5), %s1193_s22, 64, %s1195_s24, %s1180_s13  }
 0x455 PF: > { %p1343_p4 = scmp.ge.s32.totalorder %s1468_s12, 2  ;;  %s1206_s17 = sand.u32 1, %s1456_s30  }
 0x456   : > { %s1207_s28 = scalar_lea.sflag [#allocation3], %s1206_s17 }
 0x457   : > { %p1340_p7 = pnand %p1343_p4, %p1580_p6 }
 0x459   : > { %p1341_p8 = pneg %p1340_p7 }
 0x45b   : > { %1451 = dma.done.wait (%p1341_p8), %s1207_s28, 64  }
 0x45c   : > { %1453 = vsyncadd (%p1341_p8), %s1207_s28, 4294967232  ;;  %p19_p9 = scmp.ge.s32.totalorder %s1563_s15, 4   ;;  %s1915_s30 = smov %s1460_s10 }
 0x45d   : > { %s1916_s10 = smov %s1464_s11  ;;  %s1917_s11 = smov %s1574_s18 }
 0x45e   : > { %s1918_s12 = smov %s1563_s15  ;;  %21 = sbr.rel (!%p19_p9) target bundleno = 3 (0x3), region = 127 }
 0x463   :  { %1213 = vsyncpa [#allocation3], 1 }
 0x464   :  { %1215 = vsyncpa [#allocation3 + $0x1], 1 }

</bundles_post_ra>
